<compile_context>
chip_gen: v7x
topology: tpu7x:2x2x1
jax: 0.10.0
libtpu: 0.0.40
codegen_flags: <defaults>
</compile_context>

<pallas_src>
import functools

import jax
import jax.numpy as jnp
from jax.experimental import pallas as pl
from jax.experimental.pallas import tpu as pltpu

D_MODEL = 64
N_HEAD = 4
HEAD_DIM = D_MODEL // N_HEAD
D_FF = 2048
LN_EPS = 1e-5
VMEM_LIMIT_BYTES = 32 * 1024 * 1024


def _pick_tile(b):
    """Query-row tile size: 512/256/128 when it divides B, else the whole B."""
    for t in (512, 256, 128):
        if b >= t and b % t == 0:
            return t
    return b


def _bf16_exp_default():
    """bf16 EUP/VPU path exists on v6e/v7x; keep f32 elementwise math elsewhere."""
    try:
        kind = jax.devices()[0].device_kind.lower()
    except Exception:
        return False
    return ("v6" in kind) or ("v7" in kind)


def _layer_norm(y, w, b):
    mean = jnp.mean(y, axis=-1, keepdims=True)
    var = jnp.mean((y - mean) ** 2, axis=-1, keepdims=True)
    return (y - mean) * jax.lax.rsqrt(var + LN_EPS) * w + b


# --------------------------------------------------------------------------
# Kernel A: fused encoder Linear + QKV projection (Q pre-scaled), row-tiled.
# --------------------------------------------------------------------------
def _proj_kernel(x_ref, wcomb_ref, bcomb_ref, hq_ref, kv_ref):
    hqkv = jnp.dot(x_ref[...], wcomb_ref[...],
                   preferred_element_type=jnp.float32) + bcomb_ref[...]
    hq_ref[...] = hqkv[:, :2 * D_MODEL]     # [h | q*scale]
    kv_ref[...] = hqkv[:, 2 * D_MODEL:]     # [k | v]


# --------------------------------------------------------------------------
# Kernel B: self-attention (+out-proj) + FFN + LayerNorms + decoder, row-tiled.
# K/V for all B rows are resident; scores are (TQ, B) per head.
# --------------------------------------------------------------------------
def _encoder_layer_kernel(hq_ref, kv_ref, wo_t_ref, bo_ref, ln1w_ref, ln1b_ref,
                          w1_t_ref, b1_ref, w2_t_ref, b2_ref, ln2w_ref, ln2b_ref,
                          wd_ref, bd_ref, out_ref, *, exp_dtype):
    f32 = jnp.float32
    bf16 = jnp.bfloat16

    h = hq_ref[:, :D_MODEL]                         # (TQ, 64) f32
    q = hq_ref[:, D_MODEL:].astype(bf16)            # (TQ, 64), 1/sqrt(hd) folded in
    k = kv_ref[:, :D_MODEL].astype(bf16)            # (B, 64)
    v = kv_ref[:, D_MODEL:].astype(bf16)            # (B, 64)

    # ---- self-attention, nhead=4, deferred softmax normalization ----
    heads = []
    for hh in range(N_HEAD):
        lo, hi = hh * HEAD_DIM, (hh + 1) * HEAD_DIM
        s = jnp.dot(q[:, lo:hi], k[:, lo:hi].T,
                    preferred_element_type=f32)                  # (TQ, B)
        m = jnp.max(s, axis=-1, keepdims=True)
        p = jnp.exp((s - m).astype(exp_dtype))                   # unnormalized probs
        denom = jnp.sum(p.astype(f32), axis=-1, keepdims=True)   # f32 row sums
        ho = jnp.dot(p.astype(bf16), v[:, lo:hi],
                     preferred_element_type=f32)                 # (TQ, 16)
        heads.append(ho * pl.reciprocal(denom, approx=True))     # normalize (TQ,16)
    attn = jnp.concatenate(heads, axis=-1)                       # (TQ, 64)
    attn = jnp.dot(attn, wo_t_ref[...],
                   preferred_element_type=f32) + bo_ref[...]     # one K=64 push

    # residual + LayerNorm1 (post-norm)
    y = _layer_norm(h + attn, ln1w_ref[...], ln1b_ref[...])

    # ---- FFN: Linear(64,2048) -> ReLU -> Linear(2048,64), bf16 weights ----
    f1 = jnp.dot(y.astype(bf16), w1_t_ref[...], preferred_element_type=f32)
    f1 = jnp.maximum(f1 + b1_ref[...], 0.0).astype(bf16)   # fused bias+relu+cast
    f2 = jnp.dot(f1, w2_t_ref[...], preferred_element_type=f32) + b2_ref[...]

    # residual + LayerNorm2
    z = _layer_norm(y + f2, ln2w_ref[...], ln2b_ref[...])

    # ---- decoder Linear(64, 1), written lane-dense as a (1, TQ) row ----
    dec = jax.lax.dot_general(wd_ref[...], z, (((1,), (1,)), ((), ())),
                              preferred_element_type=f32) + bd_ref[...]
    out_ref[...] = dec


# --------------------------------------------------------------------------
# One-time weight re-layout (outside the jitted forward).
# --------------------------------------------------------------------------
def prepare_params(params):
    we_t = params["we"].T.astype(jnp.float32)          # (D_in, 64)
    wqkv_t = params["wqkv"].T.astype(jnp.float32)      # (64, 192) cols = [q|k|v]
    be = params["be"].astype(jnp.float32)               # (64,)
    bqkv = params["bqkv"].astype(jnp.float32)            # (192,)

    w_comb = jnp.concatenate([we_t, we_t @ wqkv_t], axis=1)          # (D_in, 256)
    b_comb = jnp.concatenate([be, be @ wqkv_t + bqkv])[None, :]      # (1, 256)

    # Fold 1/sqrt(head_dim) into the Q columns (64:128) -- zero runtime cost.
    scale = 1.0 / (HEAD_DIM ** 0.5)
    col_scale = jnp.ones((4 * D_MODEL,), jnp.float32)
    col_scale = col_scale.at[D_MODEL:2 * D_MODEL].set(scale)
    w_comb = w_comb * col_scale[None, :]
    b_comb = b_comb * col_scale[None, :]

    return {
        "w_comb": w_comb,                                        # (D_in, 256) f32
        "b_comb": b_comb,                                        # (1, 256)   f32
        "wo_t": params["wo"].T.astype(jnp.float32),              # (64, 64)
        "bo": params["bo"][None, :].astype(jnp.float32),         # (1, 64)
        "ln1w": params["ln1w"][None, :].astype(jnp.float32),
        "ln1b": params["ln1b"][None, :].astype(jnp.float32),
        "w1_t": params["w1"].T.astype(jnp.bfloat16),             # (64, 2048) bf16
        "b1": params["b1"][None, :].astype(jnp.float32),         # (1, 2048)
        "w2_t": params["w2"].T.astype(jnp.bfloat16),             # (2048, 64) bf16
        "b2": params["b2"][None, :].astype(jnp.float32),         # (1, 64)
        "ln2w": params["ln2w"][None, :].astype(jnp.float32),
        "ln2b": params["ln2b"][None, :].astype(jnp.float32),
        "wd": params["wd"].astype(jnp.float32),                  # (1, 64)
        "bd": params["bd"][None, :].astype(jnp.float32),         # (1, 1)
    }


@functools.partial(jax.jit, static_argnames=("bf16_exp",))
def simple_transformer_forward(x, prep, bf16_exp=False):
    """x: (B, input_dim) f32, prep: prepare_params(...) -> (B, 1) f32."""
    b, d_in = x.shape
    tq = _pick_tile(b)
    num_tiles = b // tq

    cparams = pltpu.CompilerParams(
        dimension_semantics=("parallel",),
        vmem_limit_bytes=VMEM_LIMIT_BYTES,
    )

    # ---- kernel A: fused encoder + QKV projection, row-tiled ----
    hq, kv = pl.pallas_call(
        _proj_kernel,
        out_shape=(jax.ShapeDtypeStruct((b, 2 * D_MODEL), jnp.float32),
                   jax.ShapeDtypeStruct((b, 2 * D_MODEL), jnp.float32)),
        grid=(num_tiles,),
        in_specs=[
            pl.BlockSpec((tq, d_in), lambda i: (i, 0)),             # x tile
            pl.BlockSpec((d_in, 4 * D_MODEL), lambda i: (0, 0)),    # resident weight
            pl.BlockSpec((1, 4 * D_MODEL), lambda i: (0, 0)),       # resident bias
        ],
        out_specs=(
            pl.BlockSpec((tq, 2 * D_MODEL), lambda i: (i, 0)),
            pl.BlockSpec((tq, 2 * D_MODEL), lambda i: (i, 0)),
        ),
        compiler_params=cparams,
    )(x, prep["w_comb"], prep["b_comb"])

    # ---- kernel B: attention + FFN + decoder, row-tiled; K/V resident ----
    weight_args = (
        prep["wo_t"], prep["bo"], prep["ln1w"], prep["ln1b"],
        prep["w1_t"], prep["b1"], prep["w2_t"], prep["b2"],
        prep["ln2w"], prep["ln2b"], prep["wd"], prep["bd"],
    )
    weight_specs = [pl.BlockSpec(w.shape, lambda i: (0, 0)) for w in weight_args]
    exp_dtype = jnp.bfloat16 if bf16_exp else jnp.float32

    out_row = pl.pallas_call(
        functools.partial(_encoder_layer_kernel, exp_dtype=exp_dtype),
        out_shape=jax.ShapeDtypeStruct((1, b), jnp.float32),
        grid=(num_tiles,),
        in_specs=[
            pl.BlockSpec((tq, 2 * D_MODEL), lambda i: (i, 0)),      # [h|q] tile
            pl.BlockSpec((b, 2 * D_MODEL), lambda i: (0, 0)),       # [k|v] resident
        ] + weight_specs,
        out_specs=pl.BlockSpec((1, tq), lambda i: (0, i)),          # lane-dense row
        compiler_params=cparams,
    )(hq, kv, *weight_args)

    return out_row.reshape(b, 1)


def init_params(input_dim, key):
    """Deterministic synthetic parameters matching the PyTorch module's shapes."""
    ks = jax.random.split(key, 10)
    n = lambda k, shape, s=0.05: (s * jax.random.normal(k, shape)).astype(jnp.float32)
    return {
        # encoder = nn.Linear(input_dim, 64)
        "we": n(ks[0], (D_MODEL, input_dim)),
        "be": n(ks[1], (D_MODEL,)),
        # self_attn in_proj / out_proj
        "wqkv": n(ks[2], (3 * D_MODEL, D_MODEL)),
        "bqkv": n(ks[3], (3 * D_MODEL,)),
        "wo": n(ks[4], (D_MODEL, D_MODEL)),
        "bo": n(ks[5], (D_MODEL,)),
        # LayerNorms (affine)
        "ln1w": jnp.ones((D_MODEL,), jnp.float32),
        "ln1b": jnp.zeros((D_MODEL,), jnp.float32),
        "ln2w": jnp.ones((D_MODEL,), jnp.float32),
        "ln2b": jnp.zeros((D_MODEL,), jnp.float32),
        # feed-forward (dim_feedforward default = 2048)
        "w1": n(ks[6], (D_FF, D_MODEL)),
        "b1": n(ks[7], (D_FF,)),
        "w2": n(ks[8], (D_MODEL, D_FF)),
        "b2": jnp.zeros((D_MODEL,), jnp.float32),
        # decoder = nn.Linear(64, 1)
        "wd": n(ks[9], (1, D_MODEL)),
        "bd": jnp.zeros((1,), jnp.float32),
    }


if __name__ == "__main__":
    # B is a multiple of 8 so every f32 sublane group is fully used.
    B, INPUT_DIM = 8, 16
    key = jax.random.PRNGKey(0)
    kx, kp = jax.random.split(key)
    x = jax.random.normal(kx, (B, INPUT_DIM), dtype=jnp.float32)
    params = init_params(INPUT_DIM, kp)
    prep = prepare_params(params)   # one-time weight re-layout, outside jit

    out = simple_transformer_forward(x, prep, bf16_exp=_bf16_exp_default())
    jax.block_until_ready(out)
    assert out.shape == (B, 1) and out.dtype == jnp.float32
    print("KERNEL_OK")
</pallas_src>

<mosaic_0001>
module attributes {stable_mosaic.version = 11 : i64} {
  func.func @_proj_kernel(%arg0: i32, %arg1: memref<8x16xf32, #tpu.memory_space<vmem>>, %arg2: memref<16x256xf32, #tpu.memory_space<vmem>>, %arg3: memref<1x256xf32, #tpu.memory_space<vmem>>, %arg4: memref<8x128xf32, #tpu.memory_space<vmem>>, %arg5: memref<8x128xf32, #tpu.memory_space<vmem>>) attributes {dimension_semantics = [#tpu.dimension_semantics<parallel>], iteration_bounds = array<i64: 1>, scalar_prefetch = 0 : i64, scratch_operands = 0 : i64, tpu.core_type = #tpu.core_type<tc>, window_params = [{transform_indices = @transform_0, window_bounds = array<i64: 8, 16>}, {pipeline_mode = #tpu.pipeline_mode<synchronous>, transform_indices = @transform_1, window_bounds = array<i64: 16, 256>}, {pipeline_mode = #tpu.pipeline_mode<synchronous>, transform_indices = @transform_2, window_bounds = array<i64: 1, 256>}, {transform_indices = @transform_3, window_bounds = array<i64: 8, 128>}, {transform_indices = @transform_4, window_bounds = array<i64: 8, 128>}]} {
    %c0 = arith.constant 0 : index
    %c0_0 = arith.constant 0 : index
    %0 = vector.load %arg1[%c0, %c0_0] : memref<8x16xf32, #tpu.memory_space<vmem>>, vector<8x16xf32>
    %c0_1 = arith.constant 0 : index
    %c0_2 = arith.constant 0 : index
    %1 = vector.load %arg2[%c0_1, %c0_2] : memref<16x256xf32, #tpu.memory_space<vmem>>, vector<16x256xf32>
    %cst = arith.constant dense<0.000000e+00> : vector<8x256xf32>
    %2 = tpu.matmul %0, %1, %cst {dimension_numbers = #tpu.dot_dimension_numbers<[1], [0], [0], [1], [0, 0, 1, 1], [], []>} : vector<8x16xf32>, vector<16x256xf32>, vector<8x256xf32> -> vector<8x256xf32>
    %c0_3 = arith.constant 0 : index
    %c0_4 = arith.constant 0 : index
    %3 = vector.load %arg3[%c0_3, %c0_4] : memref<1x256xf32, #tpu.memory_space<vmem>>, vector<1x256xf32>
    %4 = vector.broadcast %3 : vector<1x256xf32> to vector<8x256xf32>
    %5 = arith.addf %2, %4 : vector<8x256xf32>
    %6 = vector.extract_strided_slice %5 {offsets = [0, 0], sizes = [8, 128], strides = [1, 1]} : vector<8x256xf32> to vector<8x128xf32>
    %c0_5 = arith.constant 0 : index
    %c0_6 = arith.constant 0 : index
    %7 = vector.load %arg4[%c0_5, %c0_6] : memref<8x128xf32, #tpu.memory_space<vmem>>, vector<8x128xf32>
    tpu.vector_store %arg4[%c0_5, %c0_6], %6 {strides = array<i32>} : memref<8x128xf32, #tpu.memory_space<vmem>>, vector<8x128xf32>,
    %8 = vector.extract_strided_slice %5 {offsets = [0, 128], sizes = [8, 128], strides = [1, 1]} : vector<8x256xf32> to vector<8x128xf32>
    %c0_7 = arith.constant 0 : index
    %c0_8 = arith.constant 0 : index
    %9 = vector.load %arg5[%c0_7, %c0_8] : memref<8x128xf32, #tpu.memory_space<vmem>>, vector<8x128xf32>
    tpu.vector_store %arg5[%c0_7, %c0_8], %8 {strides = array<i32>} : memref<8x128xf32, #tpu.memory_space<vmem>>, vector<8x128xf32>,
    return
  }
  func.func @transform_0(%arg0: i32) -> (i32, i32) {
    %c0_i32 = arith.constant 0 : i32
    %c0_i32_0 = arith.constant 0 : i32
    return %arg0, %c0_i32 : i32, i32
  }
  func.func @transform_1(%arg0: i32) -> (i32, i32) {
    %c0_i32 = arith.constant 0 : i32
    %c0_i32_0 = arith.constant 0 : i32
    %c0_i32_1 = arith.constant 0 : i32
    return %c0_i32, %c0_i32_0 : i32, i32
  }
  func.func @transform_2(%arg0: i32) -> (i32, i32) {
    %c0_i32 = arith.constant 0 : i32
    %c0_i32_0 = arith.constant 0 : i32
    %c0_i32_1 = arith.constant 0 : i32
    return %c0_i32, %c0_i32_0 : i32, i32
  }
  func.func @transform_3(%arg0: i32) -> (i32, i32) {
    %c0_i32 = arith.constant 0 : i32
    %c0_i32_0 = arith.constant 0 : i32
    return %arg0, %c0_i32 : i32, i32
  }
  func.func @transform_4(%arg0: i32) -> (i32, i32) {
    %c0_i32 = arith.constant 0 : i32
    %c0_i32_0 = arith.constant 0 : i32
    return %arg0, %c0_i32 : i32, i32
  }
}

module attributes {stable_mosaic.version = 11 : i64} {
  func.func @_encoder_layer_kernel(%arg0: i32, %arg1: memref<8x128xf32, #tpu.memory_space<vmem>>, %arg2: memref<8x128xf32, #tpu.memory_space<vmem>>, %arg3: memref<64x64xf32, #tpu.memory_space<vmem>>, %arg4: memref<1x64xf32, #tpu.memory_space<vmem>>, %arg5: memref<1x64xf32, #tpu.memory_space<vmem>>, %arg6: memref<1x64xf32, #tpu.memory_space<vmem>>, %arg7: memref<64x2048xbf16, #tpu.memory_space<vmem>>, %arg8: memref<1x2048xf32, #tpu.memory_space<vmem>>, %arg9: memref<2048x64xbf16, #tpu.memory_space<vmem>>, %arg10: memref<1x64xf32, #tpu.memory_space<vmem>>, %arg11: memref<1x64xf32, #tpu.memory_space<vmem>>, %arg12: memref<1x64xf32, #tpu.memory_space<vmem>>, %arg13: memref<1x64xf32, #tpu.memory_space<vmem>>, %arg14: memref<1x1xf32, #tpu.memory_space<vmem>>, %arg15: memref<1x8xf32, #tpu.memory_space<vmem>>) attributes {dimension_semantics = [#tpu.dimension_semantics<parallel>], iteration_bounds = array<i64: 1>, scalar_prefetch = 0 : i64, scratch_operands = 0 : i64, tpu.core_type = #tpu.core_type<tc>, window_params = [{transform_indices = @transform_0, window_bounds = array<i64: 8, 128>}, {pipeline_mode = #tpu.pipeline_mode<synchronous>, transform_indices = @transform_1, window_bounds = array<i64: 8, 128>}, {pipeline_mode = #tpu.pipeline_mode<synchronous>, transform_indices = @transform_2, window_bounds = array<i64: 64, 64>}, {pipeline_mode = #tpu.pipeline_mode<synchronous>, transform_indices = @transform_3, window_bounds = array<i64: 1, 64>}, {pipeline_mode = #tpu.pipeline_mode<synchronous>, transform_indices = @transform_4, window_bounds = array<i64: 1, 64>}, {pipeline_mode = #tpu.pipeline_mode<synchronous>, transform_indices = @transform_5, window_bounds = array<i64: 1, 64>}, {pipeline_mode = #tpu.pipeline_mode<synchronous>, transform_indices = @transform_6, window_bounds = array<i64: 64, 2048>}, {pipeline_mode = #tpu.pipeline_mode<synchronous>, transform_indices = @transform_7, window_bounds = array<i64: 1, 2048>}, {pipeline_mode = #tpu.pipeline_mode<synchronous>, transform_indices = @transform_8, window_bounds = array<i64: 2048, 64>}, {pipeline_mode = #tpu.pipeline_mode<synchronous>, transform_indices = @transform_9, window_bounds = array<i64: 1, 64>}, {pipeline_mode = #tpu.pipeline_mode<synchronous>, transform_indices = @transform_10, window_bounds = array<i64: 1, 64>}, {pipeline_mode = #tpu.pipeline_mode<synchronous>, transform_indices = @transform_11, window_bounds = array<i64: 1, 64>}, {pipeline_mode = #tpu.pipeline_mode<synchronous>, transform_indices = @transform_12, window_bounds = array<i64: 1, 64>}, {pipeline_mode = #tpu.pipeline_mode<synchronous>, transform_indices = @transform_13, window_bounds = array<i64: 1, 1>}, {transform_indices = @transform_14, window_bounds = array<i64: 1, 8>}]} {
    %c0 = arith.constant 0 : index
    %c0_0 = arith.constant 0 : index
    %0 = vector.load %arg1[%c0, %c0_0] : memref<8x128xf32, #tpu.memory_space<vmem>>, vector<8x64xf32>
    %c0_1 = arith.constant 0 : index
    %c64 = arith.constant 64 : index
    %1 = vector.load %arg1[%c0_1, %c64] : memref<8x128xf32, #tpu.memory_space<vmem>>, vector<8x64xf32>
    %2 = arith.truncf %1 : vector<8x64xf32> to vector<8x64xbf16>
    %c0_2 = arith.constant 0 : index
    %c0_3 = arith.constant 0 : index
    %3 = vector.load %arg2[%c0_2, %c0_3] : memref<8x128xf32, #tpu.memory_space<vmem>>, vector<8x64xf32>
    %4 = arith.truncf %3 : vector<8x64xf32> to vector<8x64xbf16>
    %c0_4 = arith.constant 0 : index
    %c64_5 = arith.constant 64 : index
    %5 = vector.load %arg2[%c0_4, %c64_5] : memref<8x128xf32, #tpu.memory_space<vmem>>, vector<8x64xf32>
    %6 = arith.truncf %5 : vector<8x64xf32> to vector<8x64xbf16>
    %7 = vector.extract_strided_slice %2 {offsets = [0, 0], sizes = [8, 16], strides = [1, 1]} : vector<8x64xbf16> to vector<8x16xbf16>
    %8 = vector.extract_strided_slice %4 {offsets = [0, 0], sizes = [8, 16], strides = [1, 1]} : vector<8x64xbf16> to vector<8x16xbf16>
    %9 = tpu.transpose %8, [1, 0] : vector<8x16xbf16> -> vector<16x8xbf16>
    %cst = arith.constant dense<0.000000e+00> : vector<8x8xf32>
    %10 = tpu.matmul %7, %9, %cst {dimension_numbers = #tpu.dot_dimension_numbers<[1], [0], [0], [1], [0, 0, 1, 1], [], []>} : vector<8x16xbf16>, vector<16x8xbf16>, vector<8x8xf32> -> vector<8x8xf32>
    %cst_6 = arith.constant dense<0xFF800000> : vector<8xf32>
    %11 = vector.multi_reduction <maximumf>, %10, %cst_6 [1] : vector<8x8xf32> to vector<8xf32>
    %12 = vector.shape_cast %11 : vector<8xf32> to vector<8x1xf32>
    %13 = vector.broadcast %12 : vector<8x1xf32> to vector<8x8xf32>
    %14 = arith.subf %10, %13 : vector<8x8xf32>
    %15 = math.exp %14 : vector<8x8xf32>
    %cst_7 = arith.constant dense<0.000000e+00> : vector<8xf32>
    %16 = vector.multi_reduction <add>, %15, %cst_7 [1] : vector<8x8xf32> to vector<8xf32>
    %17 = vector.shape_cast %16 : vector<8xf32> to vector<8x1xf32>
    %18 = arith.truncf %15 : vector<8x8xf32> to vector<8x8xbf16>
    %19 = vector.extract_strided_slice %6 {offsets = [0, 0], sizes = [8, 16], strides = [1, 1]} : vector<8x64xbf16> to vector<8x16xbf16>
    %cst_8 = arith.constant dense<0.000000e+00> : vector<8x16xf32>
    %20 = tpu.matmul %18, %19, %cst_8 {dimension_numbers = #tpu.dot_dimension_numbers<[1], [0], [0], [1], [0, 0, 1, 1], [], []>} : vector<8x8xbf16>, vector<8x16xbf16>, vector<8x16xf32> -> vector<8x16xf32>
    %21 = tpu.reciprocal %17 {approx = true} : vector<8x1xf32> -> vector<8x1xf32>
    %22 = vector.broadcast %21 : vector<8x1xf32> to vector<8x16xf32>
    %23 = arith.mulf %20, %22 : vector<8x16xf32>
    %24 = vector.extract_strided_slice %2 {offsets = [0, 16], sizes = [8, 16], strides = [1, 1]} : vector<8x64xbf16> to vector<8x16xbf16>
    %25 = vector.extract_strided_slice %4 {offsets = [0, 16], sizes = [8, 16], strides = [1, 1]} : vector<8x64xbf16> to vector<8x16xbf16>
    %26 = tpu.transpose %25, [1, 0] : vector<8x16xbf16> -> vector<16x8xbf16>
    %cst_9 = arith.constant dense<0.000000e+00> : vector<8x8xf32>
    %27 = tpu.matmul %24, %26, %cst_9 {dimension_numbers = #tpu.dot_dimension_numbers<[1], [0], [0], [1], [0, 0, 1, 1], [], []>} : vector<8x16xbf16>, vector<16x8xbf16>, vector<8x8xf32> -> vector<8x8xf32>
    %cst_10 = arith.constant dense<0xFF800000> : vector<8xf32>
    %28 = vector.multi_reduction <maximumf>, %27, %cst_10 [1] : vector<8x8xf32> to vector<8xf32>
    %29 = vector.shape_cast %28 : vector<8xf32> to vector<8x1xf32>
    %30 = vector.broadcast %29 : vector<8x1xf32> to vector<8x8xf32>
    %31 = arith.subf %27, %30 : vector<8x8xf32>
    %32 = math.exp %31 : vector<8x8xf32>
    %cst_11 = arith.constant dense<0.000000e+00> : vector<8xf32>
    %33 = vector.multi_reduction <add>, %32, %cst_11 [1] : vector<8x8xf32> to vector<8xf32>
    %34 = vector.shape_cast %33 : vector<8xf32> to vector<8x1xf32>
    %35 = arith.truncf %32 : vector<8x8xf32> to vector<8x8xbf16>
    %36 = vector.extract_strided_slice %6 {offsets = [0, 16], sizes = [8, 16], strides = [1, 1]} : vector<8x64xbf16> to vector<8x16xbf16>
    %cst_12 = arith.constant dense<0.000000e+00> : vector<8x16xf32>
    %37 = tpu.matmul %35, %36, %cst_12 {dimension_numbers = #tpu.dot_dimension_numbers<[1], [0], [0], [1], [0, 0, 1, 1], [], []>} : vector<8x8xbf16>, vector<8x16xbf16>, vector<8x16xf32> -> vector<8x16xf32>
    %38 = tpu.reciprocal %34 {approx = true} : vector<8x1xf32> -> vector<8x1xf32>
    %39 = vector.broadcast %38 : vector<8x1xf32> to vector<8x16xf32>
    %40 = arith.mulf %37, %39 : vector<8x16xf32>
    %41 = vector.extract_strided_slice %2 {offsets = [0, 32], sizes = [8, 16], strides = [1, 1]} : vector<8x64xbf16> to vector<8x16xbf16>
    %42 = vector.extract_strided_slice %4 {offsets = [0, 32], sizes = [8, 16], strides = [1, 1]} : vector<8x64xbf16> to vector<8x16xbf16>
    %43 = tpu.transpose %42, [1, 0] : vector<8x16xbf16> -> vector<16x8xbf16>
    %cst_13 = arith.constant dense<0.000000e+00> : vector<8x8xf32>
    %44 = tpu.matmul %41, %43, %cst_13 {dimension_numbers = #tpu.dot_dimension_numbers<[1], [0], [0], [1], [0, 0, 1, 1], [], []>} : vector<8x16xbf16>, vector<16x8xbf16>, vector<8x8xf32> -> vector<8x8xf32>
    %cst_14 = arith.constant dense<0xFF800000> : vector<8xf32>
    %45 = vector.multi_reduction <maximumf>, %44, %cst_14 [1] : vector<8x8xf32> to vector<8xf32>
    %46 = vector.shape_cast %45 : vector<8xf32> to vector<8x1xf32>
    %47 = vector.broadcast %46 : vector<8x1xf32> to vector<8x8xf32>
    %48 = arith.subf %44, %47 : vector<8x8xf32>
    %49 = math.exp %48 : vector<8x8xf32>
    %cst_15 = arith.constant dense<0.000000e+00> : vector<8xf32>
    %50 = vector.multi_reduction <add>, %49, %cst_15 [1] : vector<8x8xf32> to vector<8xf32>
    %51 = vector.shape_cast %50 : vector<8xf32> to vector<8x1xf32>
    %52 = arith.truncf %49 : vector<8x8xf32> to vector<8x8xbf16>
    %53 = vector.extract_strided_slice %6 {offsets = [0, 32], sizes = [8, 16], strides = [1, 1]} : vector<8x64xbf16> to vector<8x16xbf16>
    %cst_16 = arith.constant dense<0.000000e+00> : vector<8x16xf32>
    %54 = tpu.matmul %52, %53, %cst_16 {dimension_numbers = #tpu.dot_dimension_numbers<[1], [0], [0], [1], [0, 0, 1, 1], [], []>} : vector<8x8xbf16>, vector<8x16xbf16>, vector<8x16xf32> -> vector<8x16xf32>
    %55 = tpu.reciprocal %51 {approx = true} : vector<8x1xf32> -> vector<8x1xf32>
    %56 = vector.broadcast %55 : vector<8x1xf32> to vector<8x16xf32>
    %57 = arith.mulf %54, %56 : vector<8x16xf32>
    %58 = vector.extract_strided_slice %2 {offsets = [0, 48], sizes = [8, 16], strides = [1, 1]} : vector<8x64xbf16> to vector<8x16xbf16>
    %59 = vector.extract_strided_slice %4 {offsets = [0, 48], sizes = [8, 16], strides = [1, 1]} : vector<8x64xbf16> to vector<8x16xbf16>
    %60 = tpu.transpose %59, [1, 0] : vector<8x16xbf16> -> vector<16x8xbf16>
    %cst_17 = arith.constant dense<0.000000e+00> : vector<8x8xf32>
    %61 = tpu.matmul %58, %60, %cst_17 {dimension_numbers = #tpu.dot_dimension_numbers<[1], [0], [0], [1], [0, 0, 1, 1], [], []>} : vector<8x16xbf16>, vector<16x8xbf16>, vector<8x8xf32> -> vector<8x8xf32>
    %cst_18 = arith.constant dense<0xFF800000> : vector<8xf32>
    %62 = vector.multi_reduction <maximumf>, %61, %cst_18 [1] : vector<8x8xf32> to vector<8xf32>
    %63 = vector.shape_cast %62 : vector<8xf32> to vector<8x1xf32>
    %64 = vector.broadcast %63 : vector<8x1xf32> to vector<8x8xf32>
    %65 = arith.subf %61, %64 : vector<8x8xf32>
    %66 = math.exp %65 : vector<8x8xf32>
    %cst_19 = arith.constant dense<0.000000e+00> : vector<8xf32>
    %67 = vector.multi_reduction <add>, %66, %cst_19 [1] : vector<8x8xf32> to vector<8xf32>
    %68 = vector.shape_cast %67 : vector<8xf32> to vector<8x1xf32>
    %69 = arith.truncf %66 : vector<8x8xf32> to vector<8x8xbf16>
    %70 = vector.extract_strided_slice %6 {offsets = [0, 48], sizes = [8, 16], strides = [1, 1]} : vector<8x64xbf16> to vector<8x16xbf16>
    %cst_20 = arith.constant dense<0.000000e+00> : vector<8x16xf32>
    %71 = tpu.matmul %69, %70, %cst_20 {dimension_numbers = #tpu.dot_dimension_numbers<[1], [0], [0], [1], [0, 0, 1, 1], [], []>} : vector<8x8xbf16>, vector<8x16xbf16>, vector<8x16xf32> -> vector<8x16xf32>
    %72 = tpu.reciprocal %68 {approx = true} : vector<8x1xf32> -> vector<8x1xf32>
    %73 = vector.broadcast %72 : vector<8x1xf32> to vector<8x16xf32>
    %74 = arith.mulf %71, %73 : vector<8x16xf32>
    %75 = tpu.concatenate %23, %40, %57, %74 in 1 : vector<8x16xf32>, vector<8x16xf32>, vector<8x16xf32>, vector<8x16xf32> -> vector<8x64xf32>
    %c0_21 = arith.constant 0 : index
    %c0_22 = arith.constant 0 : index
    %76 = vector.load %arg3[%c0_21, %c0_22] : memref<64x64xf32, #tpu.memory_space<vmem>>, vector<64x64xf32>
    %cst_23 = arith.constant dense<0.000000e+00> : vector<8x64xf32>
    %77 = tpu.matmul %75, %76, %cst_23 {dimension_numbers = #tpu.dot_dimension_numbers<[1], [0], [0], [1], [0, 0, 1, 1], [], []>} : vector<8x64xf32>, vector<64x64xf32>, vector<8x64xf32> -> vector<8x64xf32>
    %c0_24 = arith.constant 0 : index
    %c0_25 = arith.constant 0 : index
    %78 = vector.load %arg4[%c0_24, %c0_25] : memref<1x64xf32, #tpu.memory_space<vmem>>, vector<1x64xf32>
    %79 = vector.broadcast %78 : vector<1x64xf32> to vector<8x64xf32>
    %80 = arith.addf %77, %79 : vector<8x64xf32>
    %81 = arith.addf %0, %80 : vector<8x64xf32>
    %c0_26 = arith.constant 0 : index
    %c0_27 = arith.constant 0 : index
    %82 = vector.load %arg5[%c0_26, %c0_27] : memref<1x64xf32, #tpu.memory_space<vmem>>, vector<1x64xf32>
    %c0_28 = arith.constant 0 : index
    %c0_29 = arith.constant 0 : index
    %83 = vector.load %arg6[%c0_28, %c0_29] : memref<1x64xf32, #tpu.memory_space<vmem>>, vector<1x64xf32>
    %cst_30 = arith.constant dense<0.000000e+00> : vector<8xf32>
    %84 = vector.multi_reduction <add>, %81, %cst_30 [1] : vector<8x64xf32> to vector<8xf32>
    %85 = vector.shape_cast %84 : vector<8xf32> to vector<8x1xf32>
    %cst_31 = arith.constant 6.400000e+01 : f32
    %86 = vector.broadcast %cst_31 : f32 to vector<8x1xf32>
    %87 = arith.divf %85, %86 : vector<8x1xf32>
    %88 = vector.broadcast %87 : vector<8x1xf32> to vector<8x64xf32>
    %89 = arith.subf %81, %88 : vector<8x64xf32>
    %90 = arith.mulf %89, %89 : vector<8x64xf32>
    %cst_32 = arith.constant dense<0.000000e+00> : vector<8xf32>
    %91 = vector.multi_reduction <add>, %90, %cst_32 [1] : vector<8x64xf32> to vector<8xf32>
    %92 = vector.shape_cast %91 : vector<8xf32> to vector<8x1xf32>
    %cst_33 = arith.constant 6.400000e+01 : f32
    %93 = vector.broadcast %cst_33 : f32 to vector<8x1xf32>
    %94 = arith.divf %92, %93 : vector<8x1xf32>
    %95 = vector.broadcast %87 : vector<8x1xf32> to vector<8x64xf32>
    %96 = arith.subf %81, %95 : vector<8x64xf32>
    %cst_34 = arith.constant 9.99999974E-6 : f32
    %97 = vector.broadcast %cst_34 : f32 to vector<8x1xf32>
    %98 = arith.addf %94, %97 : vector<8x1xf32>
    %99 = math.rsqrt %98 : vector<8x1xf32>
    %100 = vector.broadcast %99 : vector<8x1xf32> to vector<8x64xf32>
    %101 = arith.mulf %96, %100 : vector<8x64xf32>
    %102 = vector.broadcast %82 : vector<1x64xf32> to vector<8x64xf32>
    %103 = arith.mulf %101, %102 : vector<8x64xf32>
    %104 = vector.broadcast %83 : vector<1x64xf32> to vector<8x64xf32>
    %105 = arith.addf %103, %104 : vector<8x64xf32>
    %106 = arith.truncf %105 : vector<8x64xf32> to vector<8x64xbf16>
    %c0_35 = arith.constant 0 : index
    %c0_36 = arith.constant 0 : index
    %107 = vector.load %arg7[%c0_35, %c0_36] : memref<64x2048xbf16, #tpu.memory_space<vmem>>, vector<64x2048xbf16>
    %cst_37 = arith.constant dense<0.000000e+00> : vector<8x2048xf32>
    %108 = tpu.matmul %106, %107, %cst_37 {dimension_numbers = #tpu.dot_dimension_numbers<[1], [0], [0], [1], [0, 0, 1, 1], [], []>} : vector<8x64xbf16>, vector<64x2048xbf16>, vector<8x2048xf32> -> vector<8x2048xf32>
    %c0_38 = arith.constant 0 : index
    %c0_39 = arith.constant 0 : index
    %109 = vector.load %arg8[%c0_38, %c0_39] : memref<1x2048xf32, #tpu.memory_space<vmem>>, vector<1x2048xf32>
    %110 = vector.broadcast %109 : vector<1x2048xf32> to vector<8x2048xf32>
    %111 = arith.addf %108, %110 : vector<8x2048xf32>
    %cst_40 = arith.constant 0.000000e+00 : f32
    %112 = vector.broadcast %cst_40 : f32 to vector<8x2048xf32>
    %113 = arith.maximumf %111, %112 : vector<8x2048xf32>
    %114 = arith.truncf %113 : vector<8x2048xf32> to vector<8x2048xbf16>
    %c0_41 = arith.constant 0 : index
    %c0_42 = arith.constant 0 : index
    %115 = vector.load %arg9[%c0_41, %c0_42] : memref<2048x64xbf16, #tpu.memory_space<vmem>>, vector<2048x64xbf16>
    %cst_43 = arith.constant dense<0.000000e+00> : vector<8x64xf32>
    %116 = tpu.matmul %114, %115, %cst_43 {dimension_numbers = #tpu.dot_dimension_numbers<[1], [0], [0], [1], [0, 0, 1, 1], [], []>} : vector<8x2048xbf16>, vector<2048x64xbf16>, vector<8x64xf32> -> vector<8x64xf32>
    %c0_44 = arith.constant 0 : index
    %c0_45 = arith.constant 0 : index
    %117 = vector.load %arg10[%c0_44, %c0_45] : memref<1x64xf32, #tpu.memory_space<vmem>>, vector<1x64xf32>
    %118 = vector.broadcast %117 : vector<1x64xf32> to vector<8x64xf32>
    %119 = arith.addf %116, %118 : vector<8x64xf32>
    %120 = arith.addf %105, %119 : vector<8x64xf32>
    %c0_46 = arith.constant 0 : index
    %c0_47 = arith.constant 0 : index
    %121 = vector.load %arg11[%c0_46, %c0_47] : memref<1x64xf32, #tpu.memory_space<vmem>>, vector<1x64xf32>
    %c0_48 = arith.constant 0 : index
    %c0_49 = arith.constant 0 : index
    %122 = vector.load %arg12[%c0_48, %c0_49] : memref<1x64xf32, #tpu.memory_space<vmem>>, vector<1x64xf32>
    %cst_50 = arith.constant dense<0.000000e+00> : vector<8xf32>
    %123 = vector.multi_reduction <add>, %120, %cst_50 [1] : vector<8x64xf32> to vector<8xf32>
    %124 = vector.shape_cast %123 : vector<8xf32> to vector<8x1xf32>
    %cst_51 = arith.constant 6.400000e+01 : f32
    %125 = vector.broadcast %cst_51 : f32 to vector<8x1xf32>
    %126 = arith.divf %124, %125 : vector<8x1xf32>
    %127 = vector.broadcast %126 : vector<8x1xf32> to vector<8x64xf32>
    %128 = arith.subf %120, %127 : vector<8x64xf32>
    %129 = arith.mulf %128, %128 : vector<8x64xf32>
    %cst_52 = arith.constant dense<0.000000e+00> : vector<8xf32>
    %130 = vector.multi_reduction <add>, %129, %cst_52 [1] : vector<8x64xf32> to vector<8xf32>
    %131 = vector.shape_cast %130 : vector<8xf32> to vector<8x1xf32>
    %cst_53 = arith.constant 6.400000e+01 : f32
    %132 = vector.broadcast %cst_53 : f32 to vector<8x1xf32>
    %133 = arith.divf %131, %132 : vector<8x1xf32>
    %134 = vector.broadcast %126 : vector<8x1xf32> to vector<8x64xf32>
    %135 = arith.subf %120, %134 : vector<8x64xf32>
    %cst_54 = arith.constant 9.99999974E-6 : f32
    %136 = vector.broadcast %cst_54 : f32 to vector<8x1xf32>
    %137 = arith.addf %133, %136 : vector<8x1xf32>
    %138 = math.rsqrt %137 : vector<8x1xf32>
    %139 = vector.broadcast %138 : vector<8x1xf32> to vector<8x64xf32>
    %140 = arith.mulf %135, %139 : vector<8x64xf32>
    %141 = vector.broadcast %121 : vector<1x64xf32> to vector<8x64xf32>
    %142 = arith.mulf %140, %141 : vector<8x64xf32>
    %143 = vector.broadcast %122 : vector<1x64xf32> to vector<8x64xf32>
    %144 = arith.addf %142, %143 : vector<8x64xf32>
    %c0_55 = arith.constant 0 : index
    %c0_56 = arith.constant 0 : index
    %145 = vector.load %arg13[%c0_55, %c0_56] : memref<1x64xf32, #tpu.memory_space<vmem>>, vector<1x64xf32>
    %cst_57 = arith.constant dense<0.000000e+00> : vector<1x8xf32>
    %146 = tpu.matmul %145, %144, %cst_57 {dimension_numbers = #tpu.dot_dimension_numbers<[1], [1], [0], [0], [0, 0, 1, 0], [], []>} : vector<1x64xf32>, vector<8x64xf32>, vector<1x8xf32> -> vector<1x8xf32>
    %c0_58 = arith.constant 0 : index
    %c0_59 = arith.constant 0 : index
    %147 = vector.load %arg14[%c0_58, %c0_59] : memref<1x1xf32, #tpu.memory_space<vmem>>, vector<1x1xf32>
    %148 = vector.broadcast %147 : vector<1x1xf32> to vector<1x8xf32>
    %149 = arith.addf %146, %148 : vector<1x8xf32>
    %c0_60 = arith.constant 0 : index
    %c0_61 = arith.constant 0 : index
    %150 = vector.load %arg15[%c0_60, %c0_61] : memref<1x8xf32, #tpu.memory_space<vmem>>, vector<1x8xf32>
    tpu.vector_store %arg15[%c0_60, %c0_61], %149 {strides = array<i32>} : memref<1x8xf32, #tpu.memory_space<vmem>>, vector<1x8xf32>,
    return
  }
  func.func @transform_0(%arg0: i32) -> (i32, i32) {
    %c0_i32 = arith.constant 0 : i32
    %c0_i32_0 = arith.constant 0 : i32
    return %arg0, %c0_i32 : i32, i32
  }
  func.func @transform_1(%arg0: i32) -> (i32, i32) {
    %c0_i32 = arith.constant 0 : i32
    %c0_i32_0 = arith.constant 0 : i32
    %c0_i32_1 = arith.constant 0 : i32
    return %c0_i32, %c0_i32_0 : i32, i32
  }
  func.func @transform_2(%arg0: i32) -> (i32, i32) {
    %c0_i32 = arith.constant 0 : i32
    %c0_i32_0 = arith.constant 0 : i32
    %c0_i32_1 = arith.constant 0 : i32
    return %c0_i32, %c0_i32_0 : i32, i32
  }
  func.func @transform_3(%arg0: i32) -> (i32, i32) {
    %c0_i32 = arith.constant 0 : i32
    %c0_i32_0 = arith.constant 0 : i32
    %c0_i32_1 = arith.constant 0 : i32
    return %c0_i32, %c0_i32_0 : i32, i32
  }
  func.func @transform_4(%arg0: i32) -> (i32, i32) {
    %c0_i32 = arith.constant 0 : i32
    %c0_i32_0 = arith.constant 0 : i32
    %c0_i32_1 = arith.constant 0 : i32
    return %c0_i32, %c0_i32_0 : i32, i32
  }
  func.func @transform_5(%arg0: i32) -> (i32, i32) {
    %c0_i32 = arith.constant 0 : i32
    %c0_i32_0 = arith.constant 0 : i32
    %c0_i32_1 = arith.constant 0 : i32
    return %c0_i32, %c0_i32_0 : i32, i32
  }
  func.func @transform_6(%arg0: i32) -> (i32, i32) {
    %c0_i32 = arith.constant 0 : i32
    %c0_i32_0 = arith.constant 0 : i32
    %c0_i32_1 = arith.constant 0 : i32
    return %c0_i32, %c0_i32_0 : i32, i32
  }
  func.func @transform_7(%arg0: i32) -> (i32, i32) {
    %c0_i32 = arith.constant 0 : i32
    %c0_i32_0 = arith.constant 0 : i32
    %c0_i32_1 = arith.constant 0 : i32
    return %c0_i32, %c0_i32_0 : i32, i32
  }
  func.func @transform_8(%arg0: i32) -> (i32, i32) {
    %c0_i32 = arith.constant 0 : i32
    %c0_i32_0 = arith.constant 0 : i32
    %c0_i32_1 = arith.constant 0 : i32
    return %c0_i32, %c0_i32_0 : i32, i32
  }
  func.func @transform_9(%arg0: i32) -> (i32, i32) {
    %c0_i32 = arith.constant 0 : i32
    %c0_i32_0 = arith.constant 0 : i32
    %c0_i32_1 = arith.constant 0 : i32
    return %c0_i32, %c0_i32_0 : i32, i32
  }
  func.func @transform_10(%arg0: i32) -> (i32, i32) {
    %c0_i32 = arith.constant 0 : i32
    %c0_i32_0 = arith.constant 0 : i32
    %c0_i32_1 = arith.constant 0 : i32
    return %c0_i32, %c0_i32_0 : i32, i32
  }
  func.func @transform_11(%arg0: i32) -> (i32, i32) {
    %c0_i32 = arith.constant 0 : i32
    %c0_i32_0 = arith.constant 0 : i32
    %c0_i32_1 = arith.constant 0 : i32
    return %c0_i32, %c0_i32_0 : i32, i32
  }
  func.func @transform_12(%arg0: i32) -> (i32, i32) {
    %c0_i32 = arith.constant 0 : i32
    %c0_i32_0 = arith.constant 0 : i32
    %c0_i32_1 = arith.constant 0 : i32
    return %c0_i32, %c0_i32_0 : i32, i32
  }
  func.func @transform_13(%arg0: i32) -> (i32, i32) {
    %c0_i32 = arith.constant 0 : i32
    %c0_i32_0 = arith.constant 0 : i32
    %c0_i32_1 = arith.constant 0 : i32
    return %c0_i32, %c0_i32_0 : i32, i32
  }
  func.func @transform_14(%arg0: i32) -> (i32, i32) {
    %c0_i32 = arith.constant 0 : i32
    %c0_i32_0 = arith.constant 0 : i32
    return %c0_i32, %arg0 : i32, i32
  }
}

</mosaic_0001>

<bundles_post_ra>
// kernel: simple_transformer_forward.2
= control target key start
LH: loop header
LB: loop body
LE: loop exit
PB: predicated region body
PF: predicated region fallthrough
CT: control target
= control target key end

     0   :  { %10 = vsyncpa [#allocation3], 0  ;;  %s162_s15 = smov [#allocation2]   ;;  %s222_s0 = inlined_call_operand.hbm [shape: f32[8,16], index: 0, kind: input, shape index: {}]   ;;  %s223_s1 = inlined_call_operand.vmem [shape: f32[16,256], index: 1, kind: input, shape index: {}]   ;;  %s224_s2 = inlined_call_operand.vmem [shape: f32[1,256], index: 2, kind: input, shape index: {}]   ;;  %s225_s3 = inlined_call_operand.vmem [shape: f32[8,128], index: 3, kind: output, shape index: {0}]   ;;  %s226_s4 = inlined_call_operand.vmem [shape: f32[8,128], index: 4, kind: output, shape index: {1}]  }
   0x1   :  { %s17_s16 = sshll.u32 %s162_s15, 4  ;;  %s138_s19 = scalar_lea.hbm %s222_s0, 128  ;;  %s18_s16 = int_to_ptr.vmem [resolvable:$true] %s17_s16 }
   0x2   :  { %p139_p0 = scmp.ne.s32.totalorder %s222_s0, %s138_s19  ;;  %p142_p1 = scmp.lt.u32.totalorder %s138_s19, %s222_s0 }
   0x4   :  { %p144_p2 = pnand %p142_p1, %p139_p0 }
   0x6   :  { %147 = shalt.err (!%p144_p2)
}
   0x7   :  { %s148_s24 = scalar_lea.vmem %s18_s16, 128  ;;  %p153_p4 = scmp.lt.s32.totalorder %s18_s16, %s18_s16 }
   0x8   :  { %p149_p3 = scmp.ne.s32.totalorder %s18_s16, %s148_s24  ;;  %p154_p5 = scmp.lt.s32.totalorder %s148_s24, %s148_s24 }
   0xa   :  { %p155_p6 = por %p154_p5, %p153_p4 }
   0xc   :  { %p156_p7 = pnand %p155_p6, %p149_p3 }
   0xe   :  { %159 = shalt.err (!%p156_p7)
}
   0xf   :  { %20 = dma.hbm_to_vmem [thread:$0]  %s222_s0, 128, %s18_s16, [#allocation3]  }
  0x10   :  { %160 = dma.done.wait [#allocation3], 128  }
  0x11   :  { %161 = vsyncadd [#allocation3], 4294967168  ;;  %v163_v0 = vmov 0.0   ;;  %v30_v1 = vld [vmem:[%s223_s1 + $0x8] sm:$0xff]  ;;  %v32_v2 = vld [vmem:[%s223_s1 + $0x18] sm:$0xff]  ;;  %vm45_vm0 = vcmask 130048   ;;  %v35_v8 = vlaneseq }
  0x12   :  { %113 = vmatprep.mubr.f32.mxu0 %v163_v0  ;;  %v29_v3 = vld [vmem:[%s223_s1] sm:$0xff]  ;;  %v132_v4 = vpack.c.bf16 %v32_v2, %v30_v1  ;;  %v31_v5 = vld [vmem:[%s223_s1 + $0x10] sm:$0xff] }
  0x13   :  { %v134_v6 = vpack.c.bf16 %v31_v5, %v29_v3  ;;  %v28_v7 = vld [vmem:[#allocation2] sm:$0xff]  ;;  %v36_v9 = vshrl.u32 %v35_v8, 7 }
  0x14   :  { %133 = vmatprep.subr.bf16.mxu0 %v132_v4  ;;  %v33_v11 = vld [vmem:[%s224_s2] sm:$0x3] }
  0x15   :  { %135 = vmatpush1.bf16.msra.mxu0 %v134_v6  ;;  %v37_v10 = vsub.s32 0, %v36_v9  ;;  %v41_v12 = vsub.s32 1, %v36_v9 }
  0x17   :  { %v38_v13 = vrot.slane %v33_v11, %v37_v10  ;;  %v42_v14 = vrot.slane %v33_v11, %v41_v12 }
  0x18   :  { %131 = vmatmul.mubr.msk.f32.vlgmr.msra.gmra.mrb[0].mxu0 %vm45_vm0, %v28_v7 }
  0xeb   :  { %v115_v15 = vpop.f32.mrb[0].mxu0 }
  0xec   :  { %v116_v16 = vadd.f32 %v115_v15, %v38_v13  ;;  %v117_v17 = vpop.f32.mrb[1].mxu0 }
  0xed   :  { %v118_v18 = vadd.f32 %v117_v17, %v42_v14 }
  0xee   :  { %120 = vst [vmem:[%s225_s3] sm:$0xff] %v116_v16 }
  0xef   :  { %121 = vst [vmem:[%s226_s4] sm:$0xff] %v118_v18 }
  0xf0   :  { %130 = vsyncpa [#allocation3], 1 }

// kernel: simple_transformer_forward.3
= control target key start
LH: loop header
LB: loop body
LE: loop exit
PB: predicated region body
PF: predicated region fallthrough
CT: control target
= control target key end

     0   :  { %s4585_s0 = inlined_call_operand.vmem [shape: f32[8,128], index: 0, kind: input, shape index: {}]   ;;  %s4586_s1 = inlined_call_operand.vmem [shape: f32[8,128], index: 1, kind: input, shape index: {}]   ;;  %s4587_s2 = inlined_call_operand.vmem [shape: f32[64,64], index: 2, kind: input, shape index: {}]   ;;  %s4588_s3 = inlined_call_operand.vmem [shape: f32[1,64], index: 3, kind: input, shape index: {}]   ;;  %s4589_s4 = inlined_call_operand.vmem [shape: f32[1,64], index: 4, kind: input, shape index: {}]   ;;  %s4590_s5 = inlined_call_operand.vmem [shape: f32[1,64], index: 5, kind: input, shape index: {}]   ;;  %s4591_s6 = inlined_call_operand.vmem [shape: bf16[64,2048], index: 6, kind: input, shape index: {}]   ;;  %s4592_s7 = inlined_call_operand.vmem [shape: f32[1,2048], index: 7, kind: input, shape index: {}]   ;;  %s4593_s8 = inlined_call_operand.vmem [shape: bf16[2048,64], index: 8, kind: input, shape index: {}]   ;;  %s4594_s9 = inlined_call_operand.vmem [shape: f32[1,64], index: 9, kind: input, shape index: {}]   ;;  %s4595_s10 = inlined_call_operand.vmem [shape: f32[1,64], index: 10, kind: input, shape index: {}]   ;;  %s4596_s11 = inlined_call_operand.vmem [shape: f32[1,64], index: 11, kind: input, shape index: {}]   ;;  %s4597_s12 = inlined_call_operand.vmem [shape: f32[1,64], index: 12, kind: input, shape index: {}]   ;;  %s4598_s13 = inlined_call_operand.<no memory space> [shape: f32[1,1], index: 13, kind: input, shape index: {}]   ;;  %s4599_s14 = inlined_call_operand.hbm [shape: f32[1,8], index: 14, kind: output, shape index: {}]  }
   0x1   :  { %v19_v0 = vstv %s4598_s13 }
   0x2   :  { %20 = vst [vmem:[#allocation2] sm:$0x1] %v19_v0 }
   0x3   :  { %v3734_v1 = vld [vmem:[%s4585_s0] sm:$0xff]  ;;  %vm58_vm0 = vcmask 130048   ;;  %v3641_v4 = vmov 0.0   ;;  %vm3642_vm1 = vmmov 0   ;;  %s3643_s0 = smov 64  }
   0x4   :  { %v53_v2 = vld [vmem:[%s4586_s1] sm:$0xff]  ;;  %v52_v3 = vpack.c.bf16 %v3734_v1, %v3734_v1  ;;  %3371 = vmatprep.subr.bf16.mxu0 %v3641_v4  ;;  %3373 = vmatprep.mubr.msk.bf16.mxu0 %vm3642_vm1, %v3641_v4 }
   0x5   :  { %v3742_v5 = vpack.c.bf16 %v53_v2, %v53_v2  ;;  %3377 = vmatprep.subr.bf16.mxu1 %v3641_v4  ;;  %3379 = vmatprep.mubr.msk.bf16.mxu1 %vm3642_vm1, %v3641_v4 }
   0x6   :  { %56 = vrot.lane.b32.xlu0 %v52_v3, %s3643_s0 }
   0x7   :  { %v63_v6 = vsel %vm58_vm0, %v3742_v5, 0  ;;  %117 = vrot.lane.b32.xlu1 %v3742_v5, %s3643_s0 }
   0x8   :  { %3372 = vmatpush3.bf16.xpose.msra.mxu0 %v63_v6 }
   0x9   :  { %3389 = vmatprep.subr.bf16.mxu0 %v3641_v4 }
   0xa   :  { %21 = vsyncpa [#allocation4], 0  ;;  %s3644_s1 = smov 112   ;;  %s3645_s13 = smov 48   ;;  %vm105_vm2 = vcmask 64512   ;;  %vm122_vm3 = vcmask 1043456  }
   0xb   :  { %170 = vrot.lane.b32.xlu1 %v3742_v5, %s3644_s1  ;;  %s3646_s19 = smov 96   ;;  %s3647_s20 = smov 32   ;;  %vm511_vm4 = vcmask 261120   ;;  %vm513_vm5 = vcmask 392192   ;;  %vm530_vm6 = vcmask 523264   ;;  %vm2935_vm7 = vcmask 57344  }
   0xc   :  { %s3648_s21 = smov 80   ;;  %s3649_s22 = smov 16  }
   0xd   :  { %s3652_s17 = smov [#allocation3]  }
   0xf   :  { %168 = vrot.lane.b32.xlu1 %v52_v3, %s3645_s13 }
  0x13   :  { %280 = vrot.lane.b32.xlu1 %v3742_v5, %s3646_s19 }
  0x17   :  { %278 = vrot.lane.b32.xlu1 %v52_v3, %s3647_s20 }
  0x1b   :  { %390 = vrot.lane.b32.xlu1 %v3742_v5, %s3648_s21 }
  0x1f   :  { %388 = vrot.lane.b32.xlu1 %v52_v3, %s3649_s22 }
  0x78   :  { %v57_v7 = vpop.permute.xlu0 %56 }
  0x79   :  { %3374 = vmatmul.mubr.msk.bf16.vlgmr.msra.gmra.mrb[0].mxu0 %vm58_vm0, %v57_v7  ;;  %v118_v13 = vpop.permute.xlu1 %117 }
  0x7a   :  { %3391 = vmatprep.mubr.msk.bf16.mxu0 %vm3642_vm1, %v3641_v4  ;;  %v124_v14 = vsel %vm122_vm3, %v118_v13, 0  ;;  %v516_v13 = vld [vmem:[%s4587_s2 + $0x8] sm:$0xff] }
  0x7b   :  { %3378 = vmatpush3.bf16.msra.mxu1 %v124_v14 }
  0x7c   :  { %3383 = vmatprep.subr.bf16.mxu1 %v3641_v4 }
  0x7d   :  { %v171_v18 = vpop.permute.xlu1 %170 }
  0x7e   :  { %v176_v21 = vsel %vm58_vm0, %v171_v18, 0 }
  0x81   :  { %v169_v19 = vpop.permute.xlu1 %168 }
  0x85   :  { %v281_v23 = vpop.permute.xlu1 %280 }
  0x86   :  { %v286_v25 = vsel %vm58_vm0, %v281_v23, 0  ;;  %v521_v23 = vld [vmem:[%s4587_s2 + $0x30] sm:$0xff] }
  0x89   :  { %v279_v24 = vpop.permute.xlu1 %278 }
  0x8d   :  { %v391_v26 = vpop.permute.xlu1 %390 }
  0x8e   :  { %v396_v27 = vsel %vm58_vm0, %v391_v26, 0 }
  0x91   :  { %v389_v28 = vpop.permute.xlu1 %388 }
 0x14c   :  { %v99_v8 = vpop.f32.mrb[0].mxu0 }
 0x14d   :  { %v3375_v9 = vpop.f32.mrb[1].mxu0  ;;  %v106_v10 = vsel %vm105_vm2, %v99_v8, -inf }
 0x14e   :  { %107 = vmax.xlane.f32.xlu0 %v106_v10  ;;  %v102_v11 = vpop.f32.mrb[2].mxu0 }
 0x14f   :  { %v3376_v12 = vpop.f32.mrb[3].mxu0 }
 0x150   :  { %v515_v12 = vld [vmem:[%s4587_s2] sm:$0xff] }
 0x151   :  { %v3444_v14 = vpack.c.bf16 %v516_v13, %v515_v12  ;;  %v653_v12 = vld [vmem:[%s4591_s6 + $0x88] sm:$0xff] }
 0x164   :  { %228 = vrot.lane.b32.xlu0 %v3742_v5, %s3645_s13 }
 0x1db   :  { %v108_v15 = vpop.xlane.xlu0 %107 }
 0x1dc   :  { %v109_v16 = vsub.f32 %v99_v8, %v108_v15  ;;  %v517_v15 = vld [vmem:[%s4587_s2 + $0x10] sm:$0xff] }
 0x1de   :  { %v110_v17 = vmul.f32 1.442695, %v109_v16  ;;  %v518_v16 = vld [vmem:[%s4587_s2 + $0x18] sm:$0xff] }
 0x1df   :  { %v229_v29 = vpop.permute.xlu0 %228  ;;  %v3447_v18 = vpack.c.bf16 %v518_v16, %v517_v15 }
 0x1e0   :  { %3597 = vpow2.f32 %v110_v17  ;;  %v234_v30 = vsel %vm122_vm3, %v229_v29, 0  ;;  %v3650_v17 = vmov 0.0|0.0  }
 0x1e1   :  { %3390 = vmatpush3.bf16.msra.mxu0 %v234_v30 }
 0x1e2   :  { %3401 = vmatprep.subr.bf16.mxu0 %v3641_v4 }
 0x1ea   :  { %v3767_v20 = vpop.eup %3597 }
 0x1eb   :  { %v115_v22 = vpack.c.bf16 %v3767_v20, %v3767_v20  ;;  %v112_v10 = vsel %vm105_vm2, %v3767_v20, 0.0  ;;  %v519_v20 = vld [vmem:[%s4587_s2 + $0x20] sm:$0xff] }
 0x1ed   :  { %3380 = vmatmul.mubr.msk.bf16.vlgmr.msra.gmra.mrb[0].mxu1 %vm105_vm2, %v115_v22 }
 0x1ee   :  { %3384 = vmatpush3.bf16.xpose.msra.mxu1 %v176_v21  ;;  %3385 = vmatprep.mubr.msk.bf16.mxu1 %vm3642_vm1, %v3641_v4  ;;  %v520_v21 = vld [vmem:[%s4587_s2 + $0x28] sm:$0xff] }
 0x1ef   :  { %3395 = vmatprep.subr.bf16.mxu1 %v3641_v4  ;;  %v3450_v22 = vpack.c.bf16 %v520_v21, %v519_v20  ;;  %v669_v20 = vld [vmem:[%s4591_s6 + $0x108] sm:$0xff] }
 0x1f5   :  { %3386 = vmatmul.mubr.msk.bf16.vlgmr.msra.gmra.mrb[4].mxu1 %vm58_vm0, %v169_v19 }
 0x1f6   :  { %3396 = vmatpush3.bf16.xpose.msra.mxu1 %v286_v25  ;;  %3397 = vmatprep.mubr.msk.bf16.mxu1 %vm3642_vm1, %v3641_v4 }
 0x1f7   :  { %3407 = vmatprep.subr.bf16.mxu1 %v3641_v4 }
 0x1fd   :  { %3398 = vmatmul.mubr.msk.bf16.vlgmr.msra.gmra.mrb[8].mxu1 %vm58_vm0, %v279_v24  ;;  %v522_v24 = vld [vmem:[%s4587_s2 + $0x38] sm:$0xff] }
 0x1fe   :  { %3408 = vmatpush3.bf16.xpose.msra.mxu1 %v396_v27  ;;  %3409 = vmatprep.mubr.msk.bf16.mxu1 %vm3642_vm1, %v3641_v4  ;;  %v3453_v27 = vpack.c.bf16 %v522_v24, %v521_v23 }
 0x1ff   :  { %3443 = vmatprep.subr.bf16.mxu1 %v3650_v17 }
 0x205   :  { %3410 = vmatmul.mubr.msk.bf16.vlgmr.msra.gmra.mrb[12].mxu1 %vm58_vm0, %v389_v28 }
 0x206   :  { %3435 = vmatprep.mubr.msk.f32.mxu1 %vm3642_vm1, %v3641_v4  ;;  %3445 = vmatpush3.bf16.msra.mxu1 %v3444_v14  ;;  %v661_v14 = vld [vmem:[%s4591_s6 + $0xc8] sm:$0xff] }
 0x207   :  { %3446 = vmatprep.subr.bf16.mxu1 %v3650_v17  ;;  %v2981_v16 = vcombine.low %v653_v12, %v661_v14 }
 0x20a   :  { %3448 = vmatpush3.bf16.msra.mxu1 %v3447_v18  ;;  %v668_v18 = vld [vmem:[%s4591_s6 + $0x100] sm:$0xff] }
 0x20b   :  { %3449 = vmatprep.subr.bf16.mxu1 %v3650_v17 }
 0x20e   :  { %3451 = vmatpush3.bf16.msra.mxu1 %v3450_v22  ;;  %v677_v22 = vld [vmem:[%s4591_s6 + $0x148] sm:$0xff] }
 0x20f   :  { %3452 = vmatprep.subr.bf16.mxu1 %v3650_v17  ;;  %v2982_v17 = vcombine.high %v653_v12, %v661_v14  ;;  %v2997_v24 = vcombine.low %v669_v20, %v677_v22  ;;  %v640_v12 = vld [vmem:[%s4591_s6 + $0x20] sm:$0xff]  ;;  %v641_v14 = vld [vmem:[%s4591_s6 + $0x28] sm:$0xff] }
 0x212   :  { %3454 = vmatpush3.bf16.msra.mxu1 %v3453_v27  ;;  %v692_v27 = vld [vmem:[%s4591_s6 + $0x1c0] sm:$0xff] }
 0x2c0   :  { %v3790_v31 = vpop.f32.mrb[0].mxu1 }
 0x2c1   :  { %v3381_v32 = vpop.f32.mrb[1].mxu1 }
 0x2c2   :  { %v163_v33 = vpop.f32.mrb[2].mxu1 }
 0x2c3   :  { %v3382_v34 = vpop.f32.mrb[3].mxu1 }
 0x2c8   :  { %v212_v35 = vpop.f32.mrb[4].mxu1 }
 0x2c9   :  { %v3387_v36 = vpop.f32.mrb[5].mxu1  ;;  %v218_v37 = vsel %vm105_vm2, %v212_v35, -inf }
 0x2ca   :  { %219 = vmax.xlane.f32.xlu1 %v218_v37  ;;  %v215_v38 = vpop.f32.mrb[6].mxu1 }
 0x2cb   :  { %v3388_v39 = vpop.f32.mrb[7].mxu1 }
 0x2d0   :  { %v322_v40 = vpop.f32.mrb[8].mxu1 }
 0x2d1   :  { %v3399_v41 = vpop.f32.mrb[9].mxu1  ;;  %v328_v42 = vsel %vm105_vm2, %v322_v40, -inf }
 0x2d2   :  { %329 = vmax.xlane.f32.xlu0 %v328_v42  ;;  %v325_v43 = vpop.f32.mrb[10].mxu1 }
 0x2d3   :  { %v3400_v44 = vpop.f32.mrb[11].mxu1 }
 0x2d8   :  { %v432_v45 = vpop.f32.mrb[12].mxu1 }
 0x2d9   :  { %v3411_v46 = vpop.f32.mrb[13].mxu1  ;;  %v438_v47 = vsel %vm105_vm2, %v432_v45, -inf }
 0x2da   :  { %439 = vmax.xlane.f32.xlu0 %v438_v47  ;;  %v435_v48 = vpop.f32.mrb[14].mxu1 }
 0x2db   :  { %v3412_v49 = vpop.f32.mrb[15].mxu1  ;;  %338 = vrot.lane.b32.xlu1 %v3742_v5, %s3647_s20 }
 0x2f0   :  { %448 = vrot.lane.b32.xlu0 %v3742_v5, %s3649_s22 }
 0x357   :  { %v220_v50 = vpop.xlane.xlu1 %219 }
 0x358   :  { %v221_v51 = vsub.f32 %v212_v35, %v220_v50 }
 0x35a   :  { %v222_v52 = vmul.f32 1.442695, %v221_v51 }
 0x35b   :  { %v339_v56 = vpop.permute.xlu1 %338 }
 0x35c   :  { %3599 = vpow2.f32 %v222_v52  ;;  %v344_v61 = vsel %vm122_vm3, %v339_v56, 0 }
 0x35f   :  { %v330_v53 = vpop.xlane.xlu0 %329 }
 0x360   :  { %v331_v54 = vsub.f32 %v322_v40, %v330_v53 }
 0x362   :  { %v332_v55 = vmul.f32 1.442695, %v331_v54 }
 0x364   :  { %3601 = vpow2.f32 %v332_v55  ;;  %v2959_v55 = vld [vmem:[%s4588_s3] ss:$0 sm:$0xff] }
 0x366   :  { %v3600_v57 = vpop.eup %3599 }
 0x367   :  { %v440_v58 = vpop.xlane.xlu0 %439  ;;  %v224_v59 = vsel %vm105_vm2, %v3600_v57, 0.0  ;;  %v227_v60 = vpack.c.bf16 %v3600_v57, %v3600_v57 }
 0x368   :  { %v441_v62 = vsub.f32 %v432_v45, %v440_v58  ;;  %225 = vadd.xlane.f32.xlu0 %v224_v59 }
 0x369   :  { %3392 = vmatmul.mubr.msk.bf16.vlgmr.msra.gmra.mrb[4].mxu0 %vm105_vm2, %v227_v60 }
 0x36a   :  { %v442_v63 = vmul.f32 1.442695, %v441_v62  ;;  %3402 = vmatpush3.bf16.msra.mxu0 %v344_v61  ;;  %3403 = vmatprep.mubr.msk.bf16.mxu0 %vm3642_vm1, %v3641_v4 }
 0x36b   :  { %3413 = vmatprep.subr.bf16.mxu0 %v3641_v4  ;;  %v449_v0 = vpop.permute.xlu0 %448 }
 0x36c   :  { %3603 = vpow2.f32 %v442_v63  ;;  %v454_v6 = vsel %vm122_vm3, %v449_v0, 0 }
 0x36e   :  { %v3602_v2 = vpop.eup %3601 }
 0x36f   :  { %v334_v3 = vsel %vm105_vm2, %v3602_v2, 0.0  ;;  %v337_v5 = vpack.c.bf16 %v3602_v2, %v3602_v2  ;;  %v636_v2 = vld [vmem:[%s4591_s6] sm:$0xff] }
 0x370   :  { %335 = vadd.xlane.f32.xlu1 %v334_v3  ;;  %v637_v3 = vld [vmem:[%s4591_s6 + $0x8] sm:$0xff] }
 0x371   :  { %3404 = vmatmul.mubr.msk.bf16.vlgmr.msra.gmra.mrb[8].mxu0 %vm105_vm2, %v337_v5 }
 0x372   :  { %3414 = vmatpush3.bf16.msra.mxu0 %v454_v6  ;;  %3415 = vmatprep.mubr.msk.bf16.mxu0 %vm3642_vm1, %v3641_v4  ;;  %v645_v6 = vld [vmem:[%s4591_s6 + $0x48] sm:$0xff] }
 0x376   :  { %v3604_v7 = vpop.eup %3603 }
 0x377   :  { %v444_v8 = vsel %vm105_vm2, %v3604_v7, 0.0  ;;  %v447_v9 = vpack.c.bf16 %v3604_v7, %v3604_v7 }
 0x378   :  { %445 = vadd.xlane.f32.xlu0 %v444_v8  ;;  %v2965_v8 = vcombine.low %v637_v3, %v645_v6 }
 0x379   :  { %3416 = vmatmul.mubr.msk.bf16.vlgmr.msra.gmra.mrb[12].mxu0 %vm105_vm2, %v447_v9  ;;  %v2966_v9 = vcombine.high %v637_v3, %v645_v6  ;;  %v686_v3 = vld [vmem:[%s4591_s6 + $0x190] sm:$0xff]  ;;  %v687_v6 = vld [vmem:[%s4591_s6 + $0x198] sm:$0xff] }
 0x37b   :  { %1148 = vmatprep.subr.bf16.mxu1 %v2966_v9 }
 0x37c   :  { %113 = vadd.xlane.f32.xlu0 %v112_v10  ;;  %v652_v10 = vld [vmem:[%s4591_s6 + $0x80] sm:$0xff] }
 0x3f5   :  { %v226_v11 = vpop.xlane.xlu0 %225 }
 0x3f6   :  { %3605 = vrcp.f32 %v226_v11  ;;  %v660_v11 = vld [vmem:[%s4591_s6 + $0xc0] sm:$0xff] }
 0x3f7   :  { %v2980_v13 = vcombine.high %v652_v10, %v660_v11  ;;  %v2979_v15 = vcombine.low %v652_v10, %v660_v11 }
 0x3fd   :  { %v336_v19 = vpop.xlane.xlu1 %335 }
 0x3fe   :  { %3607 = vrcp.f32 %v336_v19  ;;  %v676_v19 = vld [vmem:[%s4591_s6 + $0x140] sm:$0xff] }
 0x3ff   :  { %v2996_v21 = vcombine.high %v668_v18, %v676_v19  ;;  %v2995_v23 = vcombine.low %v668_v18, %v676_v19 }
 0x400   :  { %v3606_v25 = vpop.eup %3605 }
 0x405   :  { %v446_v32 = vpop.xlane.xlu0 %445 }
 0x406   :  { %3609 = vrcp.f32 %v446_v32 }
 0x408   :  { %v3608_v34 = vpop.eup %3607 }
 0x409   :  { %v114_v46 = vpop.xlane.xlu0 %113 }
 0x40a   :  { %3611 = vrcp.f32 %v114_v46 }
 0x410   :  { %v3610_v40 = vpop.eup %3609 }
 0x414   :  { %v3612_v47 = vpop.eup %3611 }
 0x415   :  { %v167_v49 = vmul.f32 %v3612_v47, %v3790_v31 }
 0x43c   :  { %v270_v26 = vpop.f32.mrb[4].mxu0 }
 0x43d   :  { %v277_v28 = vmul.f32 %v3606_v25, %v270_v26  ;;  %v3393_v29 = vpop.f32.mrb[5].mxu0  ;;  %v2998_v25 = vcombine.high %v669_v20, %v677_v22  ;;  %v684_v26 = vld [vmem:[%s4591_s6 + $0x180] sm:$0xff]  ;;  %v657_v22 = vld [vmem:[%s4591_s6 + $0xa8] sm:$0xff] }
 0x43e   :  { %v273_v30 = vpop.f32.mrb[6].mxu0  ;;  %v3012_v29 = vcombine.high %v684_v26, %v692_v27  ;;  %v3011_v32 = vcombine.low %v684_v26, %v692_v27  ;;  %v656_v20 = vld [vmem:[%s4591_s6 + $0xa0] sm:$0xff] }
 0x43f   :  { %499 = vrot.lane.b32.xlu0 %v277_v28, %s3649_s22  ;;  %v3394_v33 = vpop.f32.mrb[7].mxu0  ;;  %v685_v28 = vld [vmem:[%s4591_s6 + $0x188] sm:$0xff] }
 0x440   :  { %v693_v30 = vld [vmem:[%s4591_s6 + $0x1c8] sm:$0xff] }
 0x441   :  { %v3013_v33 = vcombine.low %v685_v28, %v693_v30 }
 0x444   :  { %v380_v35 = vpop.f32.mrb[8].mxu0 }
 0x445   :  { %v387_v36 = vmul.f32 %v3608_v34, %v380_v35  ;;  %v3405_v37 = vpop.f32.mrb[9].mxu0  ;;  %v3014_v34 = vcombine.high %v685_v28, %v693_v30  ;;  %v638_v35 = vld [vmem:[%s4591_s6 + $0x10] sm:$0xff]  ;;  %v672_v28 = vld [vmem:[%s4591_s6 + $0x120] sm:$0xff]  ;;  %v673_v30 = vld [vmem:[%s4591_s6 + $0x128] sm:$0xff] }
 0x446   :  { %v383_v38 = vpop.f32.mrb[10].mxu0  ;;  %v639_v37 = vld [vmem:[%s4591_s6 + $0x18] sm:$0xff] }
 0x447   :  { %503 = vrot.lane.b32.xlu1 %v387_v36, %s3647_s20  ;;  %v3406_v39 = vpop.f32.mrb[11].mxu0  ;;  %v646_v36 = vld [vmem:[%s4591_s6 + $0x50] sm:$0xff] }
 0x448   :  { %v2968_v38 = vcombine.high %v638_v35, %v646_v36  ;;  %v647_v39 = vld [vmem:[%s4591_s6 + $0x58] sm:$0xff] }
 0x44c   :  { %v490_v41 = vpop.f32.mrb[12].mxu0 }
 0x44d   :  { %v497_v42 = vmul.f32 %v3610_v40, %v490_v41  ;;  %v3417_v43 = vpop.f32.mrb[13].mxu0  ;;  %v2967_v40 = vcombine.low %v638_v35, %v646_v36  ;;  %v2969_v41 = vcombine.low %v639_v37, %v647_v39 }
 0x44e   :  { %v493_v44 = vpop.f32.mrb[14].mxu0  ;;  %v3651_v43 = vmov 0  }
 0x44f   :  { %507 = vrot.lane.b32.xlu0 %v497_v42, %s3645_s13  ;;  %v3418_v45 = vpop.f32.mrb[15].mxu0  ;;  %v2970_v42 = vcombine.high %v639_v37, %v647_v39  ;;  %1139 = vmatprep.mubr.bf16.mxu0 %v3651_v43  ;;  %v688_v37 = vld [vmem:[%s4591_s6 + $0x1a0] sm:$0xff]  ;;  %v689_v39 = vld [vmem:[%s4591_s6 + $0x1a8] sm:$0xff] }
 0x450   :  { %3467 = vset.pattern.permute.xlu1 %v3651_v43  ;;  %3468 = vset.pattern.permute.xlu0 %v3651_v43 }
 0x4b1   :  { %v500_v48 = vpop.permute.xlu0 %499 }
 0x4b2   :  { %v510_v51 = vsel %vm58_vm0, %v167_v49, %v500_v48  ;;  %v2961_v48 = vld [vmem:[%s4589_s4] ss:$0 sm:$0xff] }
 0x4b9   :  { %v504_v50 = vpop.permute.xlu1 %503 }
 0x4ba   :  { %v512_v52 = vsel %vm511_vm4, %v510_v51, %v504_v50  ;;  %v2962_v50 = vld [vmem:[%s4590_s5] ss:$0 sm:$0xff] }
 0x4c1   :  { %v508_v53 = vpop.permute.xlu0 %507 }
 0x4c2   :  { %v514_v54 = vsel %vm513_vm5, %v512_v52, %v508_v53  ;;  %v654_v52 = vld [vmem:[%s4591_s6 + $0x90] sm:$0xff] }
 0x4c3   :  { %3436 = vmatmul.mubr.msk.f32.vlgmr.msra.gmra.mrb[16].mxu1 %vm530_vm6, %v514_v54  ;;  %v662_v53 = vld [vmem:[%s4591_s6 + $0xd0] sm:$0xff]  ;;  %v655_v54 = vld [vmem:[%s4591_s6 + $0x98] sm:$0xff] }
 0x4c4   :  { %1149 = vmatpush1.bf16.msra.mxu1 %v2965_v8  ;;  %1180 = vmatprep.mubr.bf16.mxu1 %v3651_v43 }
 0x4c5   :  { %1150 = vmatprep.subr.bf16.mxu1 %v2982_v17 }
 0x4c8   :  { %1151 = vmatpush1.bf16.msra.mxu1 %v2981_v16 }
 0x4c9   :  { %1152 = vmatprep.subr.bf16.mxu1 %v2998_v25 }
 0x4cc   :  { %1153 = vmatpush1.bf16.msra.mxu1 %v2997_v24 }
 0x4cd   :  { %1154 = vmatprep.subr.bf16.mxu1 %v3014_v34 }
 0x4d0   :  { %1155 = vmatpush1.bf16.msra.mxu1 %v3013_v33 }
 0x4d1   :  { %1230 = vmatprep.subr.bf16.mxu1 %v2970_v42 }
 0x596   :  { %v600_v56 = vpop.f32.mrb[16].mxu1 }
 0x597   :  { %v601_v57 = vadd.f32 %v2959_v55, %v600_v56  ;;  %v3437_v58 = vpop.f32.mrb[17].mxu1  ;;  %v663_v55 = vld [vmem:[%s4591_s6 + $0xd8] sm:$0xff] }
 0x598   :  { %v2984_v58 = vcombine.high %v654_v52, %v662_v53 }
 0x599   :  { %v604_v31 = vadd.f32 %v601_v57, %v3734_v1  ;;  %v644_v1 = vld [vmem:[%s4591_s6 + $0x40] sm:$0xff] }
 0x59a   :  { %v2964_v5 = vcombine.high %v636_v2, %v644_v1  ;;  %v2963_v7 = vcombine.low %v636_v2, %v644_v1 }
 0x59b   :  { %v607_v59 = vsel %vm530_vm6, %v604_v31, 0.0 }
 0x59c   :  { %608 = vadd.xlane.f32.xlu0 %v607_v59  ;;  %1107 = vmatprep.subr.bf16.mxu0 %v2964_v5  ;;  %v670_v59 = vld [vmem:[%s4591_s6 + $0x110] sm:$0xff] }
 0x59d   :  { %1108 = vmatpush1.bf16.msra.mxu0 %v2963_v7  ;;  %v694_v5 = vld [vmem:[%s4591_s6 + $0x1d0] sm:$0xff]  ;;  %v695_v7 = vld [vmem:[%s4591_s6 + $0x1d8] sm:$0xff] }
 0x59e   :  { %1109 = vmatprep.subr.bf16.mxu0 %v2980_v13  ;;  %v3016_v10 = vcombine.high %v686_v3, %v694_v5  ;;  %v3018_v11 = vcombine.high %v687_v6, %v695_v7  ;;  %v648_v13 = vld [vmem:[%s4591_s6 + $0x60] sm:$0xff]  ;;  %v3015_v16 = vcombine.low %v686_v3, %v694_v5  ;;  %v3017_v17 = vcombine.low %v687_v6, %v695_v7 }
 0x59f   :  { %v2972_v18 = vcombine.high %v640_v12, %v648_v13  ;;  %v2971_v24 = vcombine.low %v640_v12, %v648_v13 }
 0x5a1   :  { %1110 = vmatpush1.bf16.msra.mxu0 %v2979_v15  ;;  %v649_v15 = vld [vmem:[%s4591_s6 + $0x68] sm:$0xff] }
 0x5a2   :  { %1111 = vmatprep.subr.bf16.mxu0 %v2996_v21  ;;  %v2974_v19 = vcombine.high %v641_v14, %v649_v15  ;;  %v664_v21 = vld [vmem:[%s4591_s6 + $0xe0] sm:$0xff]  ;;  %v2973_v25 = vcombine.low %v641_v14, %v649_v15 }
 0x5a3   :  { %v2988_v26 = vcombine.high %v656_v20, %v664_v21  ;;  %v2987_v33 = vcombine.low %v656_v20, %v664_v21  ;;  %v3472_v20 = vld [vmem:[%s4593_s8 + $0x80] sm:$0xff]   ;;  %v3473_v21 = vld [vmem:[%s4593_s8 + $0x48] sm:$0xff]  }
 0x5a5   :  { %1112 = vmatpush1.bf16.msra.mxu0 %v2995_v23  ;;  %v665_v23 = vld [vmem:[%s4591_s6 + $0xe8] sm:$0xff] }
 0x5a6   :  { %1113 = vmatprep.subr.bf16.mxu0 %v3012_v29  ;;  %v2990_v27 = vcombine.high %v657_v22, %v665_v23  ;;  %v680_v29 = vld [vmem:[%s4591_s6 + $0x160] sm:$0xff]  ;;  %v2989_v34 = vcombine.low %v657_v22, %v665_v23  ;;  %v3474_v22 = vld [vmem:[%s4593_s8 + $0xc8] sm:$0xff]  }
 0x5a7   :  { %v3004_v35 = vcombine.high %v672_v28, %v680_v29  ;;  %v3475_v23 = vld [vmem:[%s4593_s8 + $0x8] sm:$0xff]  }
 0x5a9   :  { %1114 = vmatpush1.bf16.msra.mxu0 %v3011_v32  ;;  %v681_v32 = vld [vmem:[%s4591_s6 + $0x168] sm:$0xff] }
 0x5aa   :  { %1189 = vmatprep.subr.bf16.mxu0 %v2968_v38  ;;  %v3006_v36 = vcombine.high %v673_v30, %v681_v32  ;;  %v696_v38 = vld [vmem:[%s4591_s6 + $0x1e0] sm:$0xff]  ;;  %v3005_v42 = vcombine.low %v673_v30, %v681_v32  ;;  %v3483_v30 = vld [vmem:[%s4593_s8 + $0x18] sm:$0xff]  }
 0x5ab   :  { %v3484_v32 = vld [vmem:[%s4593_s8 + $0x98] sm:$0xff]  }
 0x629   :  { %v609_v60 = vpop.xlane.xlu0 %608 }
 0x62a   :  { %v611_v61 = vmul.f32 0.015625, %v609_v60  ;;  %v678_v60 = vld [vmem:[%s4591_s6 + $0x150] sm:$0xff] }
 0x62b   :  { %v3000_v2 = vcombine.high %v670_v59, %v678_v60  ;;  %v2999_v8 = vcombine.low %v670_v59, %v678_v60 }
 0x62c   :  { %v3849_v62 = vsub.f32 %v604_v31, %v611_v61  ;;  %v2986_v31 = vcombine.high %v655_v54, %v663_v55  ;;  %v671_v61 = vld [vmem:[%s4591_s6 + $0x118] sm:$0xff] }
 0x62e   :  { %v613_v63 = vmul.f32 %v3849_v62, %v3849_v62 }
 0x630   :  { %v614_v0 = vsel %vm530_vm6, %v613_v63, 0.0  ;;  %v2983_v63 = vcombine.low %v654_v52, %v662_v53 }
 0x631   :  { %615 = vadd.xlane.f32.xlu1 %v614_v0  ;;  %v2985_v0 = vcombine.low %v655_v54, %v663_v55  ;;  %v658_v54 = vld [vmem:[%s4591_s6 + $0xb0] sm:$0xff] }
 0x632   :  { %v666_v55 = vld [vmem:[%s4591_s6 + $0xf0] sm:$0xff] }
 0x633   :  { %v2991_v3 = vcombine.low %v658_v54, %v666_v55 }
 0x6be   :  { %v616_v44 = vpop.xlane.xlu1 %615 }
 0x6bf   :  { %v617_v45 = vmul.f32 0.015625, %v616_v44  ;;  %v3020_v44 = vcombine.high %v688_v37, %v696_v38 }
 0x6c1   :  { %v618_v46 = vadd.f32 1e-05, %v617_v45 }
 0x6c3   :  { %3613 = vrsqrt.f32 %v618_v46  ;;  %v642_v46 = vld [vmem:[%s4591_s6 + $0x30] sm:$0xff] }
 0x6cd   :  { %v3614_v47 = vpop.eup %3613 }
 0x6ce   :  { %v620_v49 = vmul.f32 %v3614_v47, %v3849_v62  ;;  %v679_v62 = vld [vmem:[%s4591_s6 + $0x158] sm:$0xff]  ;;  %v650_v47 = vld [vmem:[%s4591_s6 + $0x70] sm:$0xff] }
 0x6cf   :  { %v3002_v1 = vcombine.high %v671_v61, %v679_v62  ;;  %v3001_v9 = vcombine.low %v671_v61, %v679_v62  ;;  %v2976_v52 = vcombine.high %v642_v46, %v650_v47  ;;  %v2975_v59 = vcombine.low %v642_v46, %v650_v47  ;;  %v3497_v46 = vld [vmem:[%s4593_s8 + $0x78] sm:$0xff]  }
 0x6d0   :  { %v627_v51 = vmul.f32 %v2961_v48, %v620_v49  ;;  %v643_v48 = vld [vmem:[%s4591_s6 + $0x38] sm:$0xff]  ;;  %v2992_v61 = vcombine.high %v658_v54, %v666_v55  ;;  %v4193_v55 = vld [vmem:[%s4592_s7 + $0x8] sm:$0xff] }
 0x6d1   :  { %v651_v49 = vld [vmem:[%s4591_s6 + $0x78] sm:$0xff] }
 0x6d2   :  { %v3937_v56 = vadd.f32 %v2962_v50, %v627_v51  ;;  %v3019_v50 = vcombine.low %v688_v37, %v696_v38  ;;  %v2978_v53 = vcombine.high %v643_v48, %v651_v49  ;;  %v2977_v60 = vcombine.low %v643_v48, %v651_v49  ;;  %v3489_v37 = vld [vmem:[%s4593_s8 + $0x68] sm:$0xff]   ;;  %v3498_v47 = vld [vmem:[%s4593_s8 + $0xf8] sm:$0xff]  }
 0x6d3   :  { %v3490_v38 = vld [vmem:[%s4593_s8 + $0xe8] sm:$0xff]   ;;  %v3499_v48 = vld [vmem:[%s4593_s8 + $0x38] sm:$0xff]  }
 0x6d4   :  { %v3941_v57 = vpack.c.bf16 %v3937_v56, %v3937_v56  ;;  %v3500_v49 = vld [vmem:[%s4593_s8 + $0xb8] sm:$0xff]  }
 0x6d6   :  { %3027 = vmatmul.mubr.msk.bf16.vlgmr.msra.gmra.mrb[16].mxu0 %vm530_vm6, %v3941_v57  ;;  %3028 = vmatmul.mubr.msk.bf16.vlgmr.msra.gmra.mrb[20].mxu1 %vm530_vm6, %v3941_v57 }
 0x6d7   :  { %1190 = vmatpush1.bf16.msra.mxu0 %v2967_v40  ;;  %1231 = vmatpush1.bf16.msra.mxu1 %v2969_v41  ;;  %v697_v40 = vld [vmem:[%s4591_s6 + $0x1e8] sm:$0xff]  ;;  %v3003_v41 = vcombine.low %v672_v28, %v680_v29  ;;  %v3481_v28 = vld [vmem:[%s4593_s8 + $0x58] sm:$0xff]  }
 0x6d8   :  { %1191 = vmatprep.subr.bf16.mxu0 %v2984_v58  ;;  %1232 = vmatprep.subr.bf16.mxu1 %v2986_v31  ;;  %v3022_v45 = vcombine.high %v689_v39, %v697_v40  ;;  %v3021_v51 = vcombine.low %v689_v39, %v697_v40  ;;  %v659_v58 = vld [vmem:[%s4591_s6 + $0xb8] sm:$0xff]  ;;  %v3491_v39 = vld [vmem:[%s4593_s8 + $0x28] sm:$0xff]  }
 0x6d9   :  { %1221 = vmatprep.mubr.bf16.mxu0 %v3651_v43  ;;  %1262 = vmatprep.mubr.bf16.mxu1 %v3651_v43  ;;  %v667_v31 = vld [vmem:[%s4591_s6 + $0xf8] sm:$0xff]  ;;  %v3492_v40 = vld [vmem:[%s4593_s8 + $0xa8] sm:$0xff]  }
 0x6da   :  { %v2994_v62 = vcombine.high %v659_v58, %v667_v31  ;;  %v2993_v5 = vcombine.low %v659_v58, %v667_v31  ;;  %v3482_v29 = vld [vmem:[%s4593_s8 + $0xd8] sm:$0xff]  }
 0x6db   :  { %1192 = vmatpush1.bf16.msra.mxu0 %v2983_v63  ;;  %1233 = vmatpush1.bf16.msra.mxu1 %v2985_v0  ;;  %v674_v63 = vld [vmem:[%s4591_s6 + $0x130] sm:$0xff] }
 0x6dc   :  { %1193 = vmatprep.subr.bf16.mxu0 %v3000_v2  ;;  %1234 = vmatprep.subr.bf16.mxu1 %v3002_v1  ;;  %v682_v0 = vld [vmem:[%s4591_s6 + $0x170] sm:$0xff]  ;;  %v675_v2 = vld [vmem:[%s4591_s6 + $0x138] sm:$0xff] }
 0x6dd   :  { %v683_v1 = vld [vmem:[%s4591_s6 + $0x178] sm:$0xff]  ;;  %v3008_v6 = vcombine.high %v674_v63, %v682_v0  ;;  %v3007_v12 = vcombine.low %v674_v63, %v682_v0 }
 0x6de   :  { %v3010_v7 = vcombine.high %v675_v2, %v683_v1  ;;  %v3009_v13 = vcombine.low %v675_v2, %v683_v1 }
 0x6df   :  { %1194 = vmatpush1.bf16.msra.mxu0 %v2999_v8  ;;  %1235 = vmatpush1.bf16.msra.mxu1 %v3001_v9  ;;  %v690_v8 = vld [vmem:[%s4591_s6 + $0x1b0] sm:$0xff] }
 0x6e0   :  { %1195 = vmatprep.subr.bf16.mxu0 %v3016_v10  ;;  %1236 = vmatprep.subr.bf16.mxu1 %v3018_v11  ;;  %v698_v9 = vld [vmem:[%s4591_s6 + $0x1f0] sm:$0xff]  ;;  %v691_v10 = vld [vmem:[%s4591_s6 + $0x1b8] sm:$0xff] }
 0x6e1   :  { %v699_v11 = vld [vmem:[%s4591_s6 + $0x1f8] sm:$0xff]  ;;  %v3024_v14 = vcombine.high %v690_v8, %v698_v9 }
 0x6e2   :  { %v3026_v15 = vcombine.high %v691_v10, %v699_v11 }
 0x6e3   :  { %1196 = vmatpush1.bf16.msra.mxu0 %v3015_v16  ;;  %1237 = vmatpush1.bf16.msra.mxu1 %v3017_v17  ;;  %v3023_v16 = vcombine.low %v690_v8, %v698_v9  ;;  %v3025_v17 = vcombine.low %v691_v10, %v699_v11 }
 0x6e4   :  { %1271 = vmatprep.subr.bf16.mxu0 %v2972_v18  ;;  %1312 = vmatprep.subr.bf16.mxu1 %v2974_v19  ;;  %v3469_v18 = vld [vmem:[%s4593_s8 + $0x40] sm:$0xff]  }
 0x6e5   :  { %v3471_v19 = vld [vmem:[%s4593_s8] sm:$0xff]  }
 0x6e6   :  { %3029 = vmatmul.mubr.msk.bf16.vlgmr.msra.gmra.mrb[20].mxu0 %vm530_vm6, %v3941_v57  ;;  %3030 = vmatmul.mubr.msk.bf16.vlgmr.msra.gmra.mrb[24].mxu1 %vm530_vm6, %v3941_v57 }
 0x6e7   :  { %1272 = vmatpush1.bf16.msra.mxu0 %v2971_v24  ;;  %1313 = vmatpush1.bf16.msra.mxu1 %v2973_v25  ;;  %v3476_v24 = vld [vmem:[%s4593_s8 + $0x88] sm:$0xff]   ;;  %v3477_v25 = vld [vmem:[%s4593_s8 + $0x50] sm:$0xff]  }
 0x6e8   :  { %1273 = vmatprep.subr.bf16.mxu0 %v2988_v26  ;;  %1314 = vmatprep.subr.bf16.mxu1 %v2990_v27  ;;  %v3479_v26 = vld [vmem:[%s4593_s8 + $0x10] sm:$0xff]  }
 0x6e9   :  { %1303 = vmatprep.mubr.bf16.mxu0 %v3651_v43  ;;  %1344 = vmatprep.mubr.bf16.mxu1 %v3651_v43  ;;  %v3480_v27 = vld [vmem:[%s4593_s8 + $0x90] sm:$0xff]  }
 0x6eb   :  { %1274 = vmatpush1.bf16.msra.mxu0 %v2987_v33  ;;  %1315 = vmatpush1.bf16.msra.mxu1 %v2989_v34  ;;  %v3485_v33 = vld [vmem:[%s4593_s8 + $0x60] sm:$0xff]  }
 0x6ec   :  { %1275 = vmatprep.subr.bf16.mxu0 %v3004_v35  ;;  %1316 = vmatprep.subr.bf16.mxu1 %v3006_v36  ;;  %v3486_v34 = vld [vmem:[%s4593_s8 + $0xe0] sm:$0xff]  }
 0x6ed   :  { %v3487_v35 = vld [vmem:[%s4593_s8 + $0x20] sm:$0xff]  }
 0x6ee   :  { %v3488_v36 = vld [vmem:[%s4593_s8 + $0xa0] sm:$0xff]  }
 0x6ef   :  { %1276 = vmatpush1.bf16.msra.mxu0 %v3003_v41  ;;  %1317 = vmatpush1.bf16.msra.mxu1 %v3005_v42  ;;  %v3493_v41 = vld [vmem:[%s4593_s8 + $0x70] sm:$0xff]  }
 0x6f0   :  { %1277 = vmatprep.subr.bf16.mxu0 %v3020_v44  ;;  %1318 = vmatprep.subr.bf16.mxu1 %v3022_v45  ;;  %v3494_v42 = vld [vmem:[%s4593_s8 + $0xf0] sm:$0xff]  }
 0x6f1   :  { %v3495_v44 = vld [vmem:[%s4593_s8 + $0x30] sm:$0xff]  }
 0x6f2   :  { %v3496_v45 = vld [vmem:[%s4593_s8 + $0xb0] sm:$0xff]  }
 0x6f3   :  { %1278 = vmatpush1.bf16.msra.mxu0 %v3019_v50  ;;  %1319 = vmatpush1.bf16.msra.mxu1 %v3021_v51  ;;  %v3501_v50 = vld [vmem:[%s4593_s8 + $0x140] sm:$0xff]  }
 0x6f4   :  { %1353 = vmatprep.subr.bf16.mxu0 %v2976_v52  ;;  %1394 = vmatprep.subr.bf16.mxu1 %v2978_v53  ;;  %v3502_v51 = vld [vmem:[%s4593_s8 + $0x1c0] sm:$0xff]   ;;  %v704_v52 = vlaneseq }
 0x6f6   :  { %3031 = vmatmul.mubr.msk.bf16.vlgmr.msra.gmra.mrb[24].mxu0 %vm530_vm6, %v3941_v57  ;;  %3032 = vmatmul.mubr.msk.bf16.vlgmr.msra.gmra.mrb[28].mxu1 %vm530_vm6, %v3941_v57  ;;  %v4187_v53 = vshrl.u32 %v704_v52, 7  ;;  %v3517_v52 = vld [vmem:[%s4593_s8 + $0x160] sm:$0xff]  }
 0x6f7   :  { %1354 = vmatpush1.bf16.msra.mxu0 %v2975_v59  ;;  %1395 = vmatpush1.bf16.msra.mxu1 %v2977_v60  ;;  %v4207_v60 = vld [vmem:[%s4592_s7] sm:$0xff] }
 0x6f8   :  { %1355 = vmatprep.subr.bf16.mxu0 %v2992_v61  ;;  %1396 = vmatprep.subr.bf16.mxu1 %v2994_v62  ;;  %v730_v54 = vsub.s32 6, %v4187_v53  ;;  %v4201_v31 = vsub.s32 0, %v4187_v53  ;;  %v714_v59 = vsub.s32 2, %v4187_v53  ;;  %v710_v61 = vsub.s32 1, %v4187_v53 }
 0x6f9   :  { %1385 = vmatprep.mubr.bf16.mxu0 %v3651_v43  ;;  %1426 = vmatprep.mubr.bf16.mxu1 %v3651_v43  ;;  %v3470_v43 = vld [vmem:[%s4593_s8 + $0xc0] sm:$0xff]   ;;  %v718_v62 = vsub.s32 3, %v4187_v53 }
 0x6fa   :  { %v4198_v58 = vrot.slane %v4193_v55, %v730_v54  ;;  %v707_v63 = vrot.slane %v4207_v60, %v4201_v31  ;;  %v715_v0 = vrot.slane %v4207_v60, %v714_v59  ;;  %v711_v2 = vrot.slane %v4207_v60, %v710_v61 }
 0x6fb   :  { %1356 = vmatpush1.bf16.msra.mxu0 %v2991_v3  ;;  %1397 = vmatpush1.bf16.msra.mxu1 %v2993_v5  ;;  %v719_v1 = vrot.slane %v4207_v60, %v718_v62 }
 0x6fc   :  { %1357 = vmatprep.subr.bf16.mxu0 %v3008_v6  ;;  %1398 = vmatprep.subr.bf16.mxu1 %v3010_v7 }
 0x6ff   :  { %1358 = vmatpush1.bf16.msra.mxu0 %v3007_v12  ;;  %1399 = vmatpush1.bf16.msra.mxu1 %v3009_v13 }
 0x700   :  { %1359 = vmatprep.subr.bf16.mxu0 %v3024_v14  ;;  %1400 = vmatprep.subr.bf16.mxu1 %v3026_v15 }
 0x703   :  { %1360 = vmatpush1.bf16.msra.mxu0 %v3023_v16  ;;  %1401 = vmatpush1.bf16.msra.mxu1 %v3025_v17 }
 0x704   :  { %3193 = vmatprep.subr.bf16.mxu0 %v3469_v18  ;;  %3215 = vmatprep.subr.bf16.mxu1 %v3470_v43 }
 0x706   :  { %3033 = vmatmul.mubr.msk.bf16.vlgmr.msra.gmra.mrb[28].mxu0 %vm530_vm6, %v3941_v57  ;;  %3034 = vmatmul.mubr.msk.bf16.vlgmr.msra.gmra.mrb[32].mxu1 %vm530_vm6, %v3941_v57  ;;  %v3478_v57 = vld [vmem:[%s4593_s8 + $0xd0] sm:$0xff]  }
 0x707   :  { %3194 = vmatpush3.bf16.msra.mxu0 %v3471_v19  ;;  %3216 = vmatpush3.bf16.msra.mxu1 %v3472_v20 }
 0x708   :  { %3195 = vmatprep.subr.bf16.mxu0 %v3473_v21  ;;  %3217 = vmatprep.subr.bf16.mxu1 %v3474_v22  ;;  %v3503_v21 = vld [vmem:[%s4593_s8 + $0x100] sm:$0xff]  }
 0x709   :  { %v3504_v22 = vld [vmem:[%s4593_s8 + $0x180] sm:$0xff]  }
 0x70b   :  { %3196 = vmatpush3.bf16.msra.mxu0 %v3475_v23  ;;  %3218 = vmatpush3.bf16.msra.mxu1 %v3476_v24 }
 0x70c   :  { %3197 = vmatprep.subr.bf16.mxu0 %v3477_v25  ;;  %3219 = vmatprep.subr.bf16.mxu1 %v3478_v57  ;;  %v3505_v25 = vld [vmem:[%s4593_s8 + $0x148] sm:$0xff]  }
 0x70d   :  { %v3506_v57 = vld [vmem:[%s4593_s8 + $0x1c8] sm:$0xff]  }
 0x70f   :  { %3198 = vmatpush3.bf16.msra.mxu0 %v3479_v26  ;;  %3220 = vmatpush3.bf16.msra.mxu1 %v3480_v27  ;;  %v3507_v26 = vld [vmem:[%s4593_s8 + $0x108] sm:$0xff]  }
 0x710   :  { %3199 = vmatprep.subr.bf16.mxu0 %v3481_v28  ;;  %3221 = vmatprep.subr.bf16.mxu1 %v3482_v29  ;;  %v3508_v27 = vld [vmem:[%s4593_s8 + $0x188] sm:$0xff]   ;;  %v726_v28 = vsub.s32 5, %v4187_v53  ;;  %v734_v29 = vsub.s32 7, %v4187_v53 }
 0x713   :  { %3200 = vmatpush3.bf16.msra.mxu0 %v3483_v30  ;;  %3222 = vmatpush3.bf16.msra.mxu1 %v3484_v32  ;;  %v3509_v30 = vld [vmem:[%s4593_s8 + $0x150] sm:$0xff]  }
 0x714   :  { %3201 = vmatprep.subr.bf16.mxu0 %v3485_v33  ;;  %3223 = vmatprep.subr.bf16.mxu1 %v3486_v34  ;;  %v3510_v32 = vld [vmem:[%s4593_s8 + $0x1d0] sm:$0xff]   ;;  %v727_v33 = vrot.slane %v4207_v60, %v726_v28  ;;  %v735_v34 = vrot.slane %v4207_v60, %v734_v29 }
 0x717   :  { %3202 = vmatpush3.bf16.msra.mxu0 %v3487_v35  ;;  %3224 = vmatpush3.bf16.msra.mxu1 %v3488_v36  ;;  %v3511_v35 = vld [vmem:[%s4593_s8 + $0x110] sm:$0xff]  }
 0x718   :  { %3203 = vmatprep.subr.bf16.mxu0 %v3489_v37  ;;  %3225 = vmatprep.subr.bf16.mxu1 %v3490_v38  ;;  %v3512_v36 = vld [vmem:[%s4593_s8 + $0x190] sm:$0xff]   ;;  %v3513_v37 = vld [vmem:[%s4593_s8 + $0x158] sm:$0xff]  }
 0x719   :  { %v3514_v38 = vld [vmem:[%s4593_s8 + $0x1d8] sm:$0xff]  }
 0x71b   :  { %3204 = vmatpush3.bf16.msra.mxu0 %v3491_v39  ;;  %3226 = vmatpush3.bf16.msra.mxu1 %v3492_v40 }
 0x71c   :  { %3205 = vmatprep.subr.bf16.mxu0 %v3493_v41  ;;  %3227 = vmatprep.subr.bf16.mxu1 %v3494_v42 }
 0x71f   :  { %3206 = vmatpush3.bf16.msra.mxu0 %v3495_v44  ;;  %3228 = vmatpush3.bf16.msra.mxu1 %v3496_v45 }
 0x720   :  { %3207 = vmatprep.subr.bf16.mxu0 %v3497_v46  ;;  %3229 = vmatprep.subr.bf16.mxu1 %v3498_v47 }
 0x723   :  { %3208 = vmatpush3.bf16.msra.mxu0 %v3499_v48  ;;  %3230 = vmatpush3.bf16.msra.mxu1 %v3500_v49  ;;  %v3515_v48 = vld [vmem:[%s4593_s8 + $0x118] sm:$0xff]  }
 0x724   :  { %3237 = vmatprep.subr.bf16.mxu0 %v3501_v50  ;;  %3259 = vmatprep.subr.bf16.mxu1 %v3502_v51  ;;  %v3516_v49 = vld [vmem:[%s4593_s8 + $0x198] sm:$0xff]  }
 0x7a9   :  { %v1141_v3 = vpop.f32.mrb[16].mxu0  ;;  %v1182_v5 = vpop.f32.mrb[20].mxu1 }
 0x7aa   :  { %v1142_v6 = vadd.f32 %v1141_v3, %v707_v63  ;;  %v1183_v7 = vadd.f32 %v1182_v5, %v715_v0  ;;  %v1143_v8 = vpop.f32.mrb[17].mxu0  ;;  %v1184_v9 = vpop.f32.mrb[21].mxu1  ;;  %v3518_v63 = vld [vmem:[%s4593_s8 + $0x1e0] sm:$0xff]  }
 0x7ab   :  { %v1144_v10 = vadd.f32 %v1143_v8, %v711_v2  ;;  %v1185_v11 = vadd.f32 %v1184_v9, %v719_v1  ;;  %v1145_v12 = vpop.f32.mrb[18].mxu0  ;;  %v1186_v13 = vpop.f32.mrb[22].mxu1  ;;  %v3519_v5 = vld [vmem:[%s4593_s8 + $0x120] sm:$0xff]   ;;  %v3521_v8 = vld [vmem:[%s4593_s8 + $0x168] sm:$0xff]  }
 0x7ac   :  { %v1435_v14 = vmax.f32 %v1142_v6, 0.0  ;;  %v1437_v15 = vmax.f32 %v1183_v7, 0.0  ;;  %v1146_v16 = vpop.f32.mrb[19].mxu0  ;;  %v1187_v17 = vpop.f32.mrb[23].mxu1  ;;  %v3520_v6 = vld [vmem:[%s4593_s8 + $0x1a0] sm:$0xff]   ;;  %v722_v7 = vsub.s32 4, %v4187_v53  ;;  %v731_v13 = vrot.slane %v4207_v60, %v730_v54 }
 0x7ad   :  { %v1436_v18 = vmax.f32 %v1144_v10, 0.0  ;;  %v1438_v43 = vmax.f32 %v1185_v11, 0.0  ;;  %v3522_v9 = vld [vmem:[%s4593_s8 + $0x1e8] sm:$0xff]   ;;  %v747_v16 = vrot.slane %v4193_v55, %v714_v59  ;;  %v743_v54 = vrot.slane %v4193_v55, %v710_v61  ;;  %v3527_v17 = vld [vmem:[%s4593_s8 + $0x130] sm:$0xff]   ;;  %v3529_v61 = vld [vmem:[%s4593_s8 + $0x178] sm:$0xff]  }
 0x7ae   :  { %v1451_v23 = vpack.c.bf16 %v1435_v14, %v1435_v14  ;;  %v1453_v24 = vpack.c.bf16 %v1437_v15, %v1437_v15  ;;  %v3523_v10 = vld [vmem:[%s4593_s8 + $0x128] sm:$0xff]   ;;  %v723_v12 = vrot.slane %v4207_v60, %v722_v7  ;;  %v3525_v14 = vld [vmem:[%s4593_s8 + $0x170] sm:$0xff]   ;;  %v751_v60 = vrot.slane %v4193_v55, %v718_v62  ;;  %v3530_v62 = vld [vmem:[%s4593_s8 + $0x1f8] sm:$0xff]  }
 0x7af   :  { %v1452_v19 = vpack.c.bf16 %v1436_v18, %v1436_v18  ;;  %v1454_v20 = vpack.c.bf16 %v1438_v43, %v1438_v43  ;;  %v3524_v11 = vld [vmem:[%s4593_s8 + $0x1a8] sm:$0xff]   ;;  %v3526_v15 = vld [vmem:[%s4593_s8 + $0x1f0] sm:$0xff]   ;;  %v3562_v53 = vld [vmem:[%s4593_s8 + $0x2f8] sm:$0xff]  }
 0x7b0   :  { %v3528_v18 = vld [vmem:[%s4593_s8 + $0x1b0] sm:$0xff]  }
 0x7b1   :  { %2530 = vmatprep.mubr.bf16.mxu0 %v1452_v19  ;;  %2570 = vmatprep.mubr.bf16.mxu1 %v1454_v20 }
 0x7b2   :  { %2531 = vmatmul.mubr.bf16.vlgmr.msra.gmra.mrb[32].mxu0 %v1451_v23  ;;  %2571 = vmatmul.mubr.bf16.vlgmr.msra.gmra.mrb[36].mxu1 %v1453_v24 }
 0x7b3   :  { %3238 = vmatpush3.bf16.msra.mxu0 %v3503_v21  ;;  %3260 = vmatpush3.bf16.msra.mxu1 %v3504_v22 }
 0x7b4   :  { %3239 = vmatprep.subr.bf16.mxu0 %v3505_v25  ;;  %3261 = vmatprep.subr.bf16.mxu1 %v3506_v57 }
 0x7b7   :  { %3240 = vmatpush3.bf16.msra.mxu0 %v3507_v26  ;;  %3262 = vmatpush3.bf16.msra.mxu1 %v3508_v27  ;;  %v3531_v27 = vld [vmem:[%s4593_s8 + $0x138] sm:$0xff]  }
 0x7b8   :  { %3241 = vmatprep.subr.bf16.mxu0 %v3509_v30  ;;  %3263 = vmatprep.subr.bf16.mxu1 %v3510_v32  ;;  %v3532_v30 = vld [vmem:[%s4593_s8 + $0x1b8] sm:$0xff]  }
 0x7b9   :  { %v1223_v39 = vpop.f32.mrb[20].mxu0  ;;  %v1264_v40 = vpop.f32.mrb[24].mxu1 }
 0x7ba   :  { %v1225_v41 = vpop.f32.mrb[21].mxu0  ;;  %v1266_v42 = vpop.f32.mrb[25].mxu1  ;;  %v1224_v43 = vadd.f32 %v1223_v39, %v723_v12  ;;  %v1265_v59 = vadd.f32 %v1264_v40, %v731_v13  ;;  %v3535_v40 = vld [vmem:[%s4593_s8 + $0x200] sm:$0xff]   ;;  %v3547_v13 = vld [vmem:[%s4593_s8 + $0x218] sm:$0xff]  }
 0x7bb   :  { %v1226_v44 = vadd.f32 %v1225_v41, %v727_v33  ;;  %v1267_v45 = vadd.f32 %v1266_v42, %v735_v34  ;;  %v1227_v46 = vpop.f32.mrb[22].mxu0  ;;  %v1268_v47 = vpop.f32.mrb[26].mxu1  ;;  %3242 = vmatpush3.bf16.msra.mxu0 %v3511_v35  ;;  %3264 = vmatpush3.bf16.msra.mxu1 %v3512_v36  ;;  %v3533_v36 = vld [vmem:[%s4593_s8 + $0x240] sm:$0xff]  }
 0x7bc   :  { %v1228_v50 = vpop.f32.mrb[23].mxu0  ;;  %v1269_v51 = vpop.f32.mrb[27].mxu1  ;;  %3243 = vmatprep.subr.bf16.mxu0 %v3513_v37  ;;  %3265 = vmatprep.subr.bf16.mxu1 %v3514_v38  ;;  %v1439_v32 = vmax.f32 %v1224_v43, 0.0  ;;  %v1441_v33 = vmax.f32 %v1265_v59, 0.0  ;;  %v3534_v37 = vld [vmem:[%s4593_s8 + $0x2c0] sm:$0xff]   ;;  %v3537_v46 = vld [vmem:[%s4593_s8 + $0x248] sm:$0xff]  }
 0x7bd   :  { %v1440_v0 = vmax.f32 %v1226_v44, 0.0  ;;  %v1442_v2 = vmax.f32 %v1267_v45, 0.0  ;;  %v3536_v44 = vld [vmem:[%s4593_s8 + $0x280] sm:$0xff]   ;;  %v3538_v47 = vld [vmem:[%s4593_s8 + $0x2c8] sm:$0xff]   ;;  %v3541_v51 = vld [vmem:[%s4593_s8 + $0x250] sm:$0xff]  }
 0x7be   :  { %v1455_v41 = vpack.c.bf16 %v1439_v32, %v1439_v32  ;;  %v1457_v42 = vpack.c.bf16 %v1441_v33, %v1441_v33  ;;  %v3540_v50 = vld [vmem:[%s4593_s8 + $0x288] sm:$0xff]   ;;  %v3565_v32 = vld [vmem:[%s4593_s8 + $0x340] sm:$0xff]  }
 0x7bf   :  { %v1456_v1 = vpack.c.bf16 %v1440_v0, %v1440_v0  ;;  %v1458_v3 = vpack.c.bf16 %v1442_v2, %v1442_v2  ;;  %3244 = vmatpush3.bf16.msra.mxu0 %v3515_v48  ;;  %3266 = vmatpush3.bf16.msra.mxu1 %v3516_v49  ;;  %v3539_v49 = vld [vmem:[%s4593_s8 + $0x208] sm:$0xff]   ;;  %v3543_v0 = vld [vmem:[%s4593_s8 + $0x210] sm:$0xff]  }
 0x7c0   :  { %3245 = vmatprep.subr.bf16.mxu0 %v3517_v52  ;;  %3267 = vmatprep.subr.bf16.mxu1 %v3518_v63  ;;  %v3542_v52 = vld [vmem:[%s4593_s8 + $0x2d0] sm:$0xff]   ;;  %v755_v63 = vrot.slane %v4193_v55, %v722_v7  ;;  %v3554_v43 = vld [vmem:[%s4593_s8 + $0x2e8] sm:$0xff]  }
 0x7c1   :  { %2610 = vmatprep.mubr.bf16.mxu0 %v1456_v1  ;;  %2650 = vmatprep.mubr.bf16.mxu1 %v1458_v3  ;;  %v3544_v2 = vld [vmem:[%s4593_s8 + $0x290] sm:$0xff]   ;;  %v3545_v1 = vld [vmem:[%s4593_s8 + $0x258] sm:$0xff]   ;;  %v3555_v59 = vld [vmem:[%s4593_s8 + $0x228] sm:$0xff]  }
 0x7c3   :  { %3246 = vmatpush3.bf16.msra.mxu0 %v3519_v5  ;;  %3268 = vmatpush3.bf16.msra.mxu1 %v3520_v6  ;;  %v3546_v6 = vld [vmem:[%s4593_s8 + $0x2d8] sm:$0xff]  }
 0x7c4   :  { %3247 = vmatprep.subr.bf16.mxu0 %v3521_v8  ;;  %3269 = vmatprep.subr.bf16.mxu1 %v3522_v9 }
 0x7c7   :  { %3248 = vmatpush3.bf16.msra.mxu0 %v3523_v10  ;;  %3270 = vmatpush3.bf16.msra.mxu1 %v3524_v11 }
 0x7c8   :  { %3249 = vmatprep.subr.bf16.mxu0 %v3525_v14  ;;  %3271 = vmatprep.subr.bf16.mxu1 %v3526_v15 }
 0x7c9   :  { %v4330_v19 = vpop.f32.mrb[24].mxu0  ;;  %v1346_v20 = vpop.f32.mrb[28].mxu1 }
 0x7ca   :  { %v4332_v21 = vadd.f32 %v1346_v20, %v747_v16  ;;  %v1307_v22 = vpop.f32.mrb[25].mxu0  ;;  %v1348_v23 = vpop.f32.mrb[29].mxu1  ;;  %v3548_v16 = vld [vmem:[%s4593_s8 + $0x298] sm:$0xff]   ;;  %v3557_v20 = vld [vmem:[%s4593_s8 + $0x270] sm:$0xff]  }
 0x7cb   :  { %v1308_v24 = vadd.f32 %v1307_v22, %v743_v54  ;;  %v1349_v25 = vadd.f32 %v1348_v23, %v751_v60  ;;  %v1309_v57 = vpop.f32.mrb[26].mxu0  ;;  %v1350_v26 = vpop.f32.mrb[30].mxu1  ;;  %3250 = vmatpush3.bf16.msra.mxu0 %v3527_v17  ;;  %3272 = vmatpush3.bf16.msra.mxu1 %v3528_v18  ;;  %v3550_v54 = vld [vmem:[%s4593_s8 + $0x2e0] sm:$0xff]   ;;  %v3553_v18 = vld [vmem:[%s4593_s8 + $0x268] sm:$0xff]   ;;  %v3558_v22 = vld [vmem:[%s4593_s8 + $0x2f0] sm:$0xff]   ;;  %v759_v23 = vrot.slane %v4193_v55, %v726_v28 }
 0x7cc   :  { %v1310_v34 = vpop.f32.mrb[27].mxu0  ;;  %v1351_v35 = vpop.f32.mrb[31].mxu1  ;;  %3251 = vmatprep.subr.bf16.mxu0 %v3529_v61  ;;  %3273 = vmatprep.subr.bf16.mxu1 %v3530_v62  ;;  %v3551_v60 = vld [vmem:[%s4593_s8 + $0x220] sm:$0xff]   ;;  %v739_v61 = vrot.slane %v4193_v55, %v4201_v31  ;;  %v3556_v62 = vld [vmem:[%s4593_s8 + $0x2a8] sm:$0xff]   ;;  %v3560_v26 = vld [vmem:[%s4593_s8 + $0x2b0] sm:$0xff]   ;;  %v1445_v33 = vmax.f32 %v4332_v21, 0.0 }
 0x7cd   :  { %v1444_v38 = vmax.f32 %v1308_v24, 0.0  ;;  %v1446_v39 = vmax.f32 %v1349_v25, 0.0  ;;  %v3552_v17 = vld [vmem:[%s4593_s8 + $0x2a0] sm:$0xff]   ;;  %v767_v24 = vrot.slane %v4193_v55, %v734_v29  ;;  %v3559_v25 = vld [vmem:[%s4593_s8 + $0x230] sm:$0xff]   ;;  %v3561_v28 = vld [vmem:[%s4593_s8 + $0x278] sm:$0xff]  }
 0x7ce   :  { %v1306_v57 = vadd.f32 %v4330_v19, %v739_v61  ;;  %v3563_v19 = vld [vmem:[%s4593_s8 + $0x238] sm:$0xff]   ;;  %v3566_v34 = vld [vmem:[%s4593_s8 + $0x3c0] sm:$0xff]   ;;  %v1461_v21 = vpack.c.bf16 %v1445_v33, %v1445_v33 }
 0x7cf   :  { %3252 = vmatpush3.bf16.msra.mxu0 %v3531_v27  ;;  %3274 = vmatpush3.bf16.msra.mxu1 %v3532_v30  ;;  %v1460_v45 = vpack.c.bf16 %v1444_v38, %v1444_v38  ;;  %v1462_v48 = vpack.c.bf16 %v1446_v39, %v1446_v39  ;;  %v3564_v30 = vld [vmem:[%s4593_s8 + $0x2b8] sm:$0xff]   ;;  %v3568_v39 = vld [vmem:[%s4593_s8 + $0x380] sm:$0xff]  }
 0x7d0   :  { %3281 = vmatprep.subr.bf16.mxu0 %v3533_v36  ;;  %3303 = vmatprep.subr.bf16.mxu1 %v3534_v37  ;;  %v1443_v27 = vmax.f32 %v1306_v57, 0.0  ;;  %v3567_v37 = vld [vmem:[%s4593_s8 + $0x300] sm:$0xff]  }
 0x7d2   :  { %2611 = vmatmul.mubr.bf16.vlgmr.msra.gmra.mrb[36].mxu0 %v1455_v41  ;;  %2651 = vmatmul.mubr.bf16.vlgmr.msra.gmra.mrb[40].mxu1 %v1457_v42  ;;  %v1459_v38 = vpack.c.bf16 %v1443_v27, %v1443_v27  ;;  %v3570_v42 = vld [vmem:[%s4593_s8 + $0x3c8] sm:$0xff]  }
 0x7d3   :  { %3282 = vmatpush3.bf16.msra.mxu0 %v3535_v40  ;;  %2690 = vmatprep.mubr.bf16.mxu0 %v1460_v45  ;;  %v3569_v40 = vld [vmem:[%s4593_s8 + $0x348] sm:$0xff]  }
 0x7d4   :  { %3304 = vmatpush3.bf16.msra.mxu1 %v3536_v44  ;;  %2730 = vmatprep.mubr.bf16.mxu1 %v1462_v48  ;;  %v3571_v45 = vld [vmem:[%s4593_s8 + $0x308] sm:$0xff]   ;;  %v3574_v48 = vld [vmem:[%s4593_s8 + $0x3d0] sm:$0xff]  }
 0x7d5   :  { %3283 = vmatprep.subr.bf16.mxu0 %v3537_v46  ;;  %3305 = vmatprep.subr.bf16.mxu1 %v3538_v47  ;;  %v3572_v46 = vld [vmem:[%s4593_s8 + $0x388] sm:$0xff]   ;;  %v3573_v47 = vld [vmem:[%s4593_s8 + $0x350] sm:$0xff]  }
 0x7d7   :  { %3284 = vmatpush3.bf16.msra.mxu0 %v3539_v49  ;;  %v3575_v49 = vld [vmem:[%s4593_s8 + $0x310] sm:$0xff]  }
 0x7d8   :  { %3306 = vmatpush3.bf16.msra.mxu1 %v3540_v50  ;;  %3285 = vmatprep.subr.bf16.mxu0 %v3541_v51  ;;  %v3576_v50 = vld [vmem:[%s4593_s8 + $0x390] sm:$0xff]   ;;  %v3577_v51 = vld [vmem:[%s4593_s8 + $0x358] sm:$0xff]  }
 0x7d9   :  { %v1387_v3 = vpop.f32.mrb[28].mxu0  ;;  %v1428_v5 = vpop.f32.mrb[32].mxu1  ;;  %3307 = vmatprep.subr.bf16.mxu1 %v3542_v52  ;;  %v3578_v52 = vld [vmem:[%s4593_s8 + $0x3d8] sm:$0xff]  }
 0x7da   :  { %v4385_v7 = vadd.f32 %v1387_v3, %v755_v63  ;;  %v4388_v8 = vadd.f32 %v1428_v5, %v4198_v58  ;;  %v1389_v9 = vpop.f32.mrb[29].mxu0  ;;  %v1430_v10 = vpop.f32.mrb[33].mxu1  ;;  %v3549_v58 = vld [vmem:[%s4593_s8 + $0x260] sm:$0xff]   ;;  %v3579_v63 = vld [vmem:[%s4593_s8 + $0x318] sm:$0xff]  }
 0x7db   :  { %v1391_v11 = vpop.f32.mrb[30].mxu0  ;;  %v1432_v12 = vpop.f32.mrb[34].mxu1  ;;  %3286 = vmatpush3.bf16.msra.mxu0 %v3543_v0  ;;  %v1390_v55 = vadd.f32 %v1389_v9, %v759_v23  ;;  %v1431_v29 = vadd.f32 %v1430_v10, %v767_v24  ;;  %v3580_v0 = vld [vmem:[%s4593_s8 + $0x398] sm:$0xff]   ;;  %v3583_v3 = vld [vmem:[%s4593_s8 + $0x320] sm:$0xff]   ;;  %v3586_v9 = vld [vmem:[%s4593_s8 + $0x3e8] sm:$0xff]  }
 0x7dc   :  { %3308 = vmatpush3.bf16.msra.mxu1 %v3544_v2  ;;  %v1392_v14 = vpop.f32.mrb[31].mxu0  ;;  %v1433_v15 = vpop.f32.mrb[35].mxu1  ;;  %3287 = vmatprep.subr.bf16.mxu0 %v3545_v1  ;;  %v3581_v2 = vld [vmem:[%s4593_s8 + $0x360] sm:$0xff]   ;;  %v3587_v10 = vld [vmem:[%s4593_s8 + $0x328] sm:$0xff]   ;;  %v3589_v12 = vld [vmem:[%s4593_s8 + $0x370] sm:$0xff]  }
 0x7dd   :  { %3309 = vmatprep.subr.bf16.mxu1 %v3546_v6  ;;  %v1448_v35 = vmax.f32 %v1390_v55, 0.0  ;;  %v1450_v36 = vmax.f32 %v1431_v29, 0.0  ;;  %v3582_v1 = vld [vmem:[%s4593_s8 + $0x3e0] sm:$0xff]   ;;  %v3585_v6 = vld [vmem:[%s4593_s8 + $0x368] sm:$0xff]   ;;  %v3591_v14 = vld [vmem:[%s4593_s8 + $0x330] sm:$0xff]  }
 0x7de   :  { %v3584_v5 = vld [vmem:[%s4593_s8 + $0x3a0] sm:$0xff]   ;;  %v3588_v11 = vld [vmem:[%s4593_s8 + $0x3a8] sm:$0xff]   ;;  %v3592_v15 = vld [vmem:[%s4593_s8 + $0x3b0] sm:$0xff]  }
 0x7df   :  { %3288 = vmatpush3.bf16.msra.mxu0 %v3547_v13  ;;  %v1464_v41 = vpack.c.bf16 %v1448_v35, %v1448_v35  ;;  %v1466_v44 = vpack.c.bf16 %v1450_v36, %v1450_v36  ;;  %v3590_v13 = vld [vmem:[%s4593_s8 + $0x3f0] sm:$0xff]  }
 0x7e0   :  { %3310 = vmatpush3.bf16.msra.mxu1 %v3548_v16  ;;  %3289 = vmatprep.subr.bf16.mxu0 %v3549_v58  ;;  %v3593_v16 = vld [vmem:[%s4593_s8 + $0x378] sm:$0xff]  }
 0x7e1   :  { %3311 = vmatprep.subr.bf16.mxu1 %v3550_v54  ;;  %v3594_v58 = vld [vmem:[%s4593_s8 + $0x3f8] sm:$0xff]  }
 0x7e2   :  { %v3595_v54 = vld [vmem:[%s4593_s8 + $0x338] sm:$0xff]  }
 0x7e3   :  { %3290 = vmatpush3.bf16.msra.mxu0 %v3551_v60  ;;  %v1447_v60 = vmax.f32 %v4385_v7, 0.0 }
 0x7e4   :  { %3312 = vmatpush3.bf16.msra.mxu1 %v3552_v17  ;;  %3291 = vmatprep.subr.bf16.mxu0 %v3553_v18  ;;  %v3596_v17 = vld [vmem:[%s4593_s8 + $0x3b8] sm:$0xff]   ;;  %v1449_v18 = vmax.f32 %v4388_v8, 0.0 }
 0x7e5   :  { %3313 = vmatprep.subr.bf16.mxu1 %v3554_v43  ;;  %v1463_v43 = vpack.c.bf16 %v1447_v60, %v1447_v60 }
 0x7e7   :  { %3292 = vmatpush3.bf16.msra.mxu0 %v3555_v59  ;;  %v1465_v59 = vpack.c.bf16 %v1449_v18, %v1449_v18 }
 0x7e8   :  { %3314 = vmatpush3.bf16.msra.mxu1 %v3556_v62  ;;  %3293 = vmatprep.subr.bf16.mxu0 %v3557_v20  ;;  %v3035_v62 = vld [vmem:[%s4594_s9] ss:$0 sm:$0xff] }
 0x7e9   :  { %3315 = vmatprep.subr.bf16.mxu1 %v3558_v22 }
 0x7eb   :  { %3294 = vmatpush3.bf16.msra.mxu0 %v3559_v25 }
 0x7ec   :  { %3316 = vmatpush3.bf16.msra.mxu1 %v3560_v26  ;;  %3295 = vmatprep.subr.bf16.mxu0 %v3561_v28 }
 0x7ed   :  { %3317 = vmatprep.subr.bf16.mxu1 %v3562_v53 }
 0x7ef   :  { %3296 = vmatpush3.bf16.msra.mxu0 %v3563_v19 }
 0x7f0   :  { %3318 = vmatpush3.bf16.msra.mxu1 %v3564_v30  ;;  %3325 = vmatprep.subr.bf16.mxu0 %v3565_v32 }
 0x7f1   :  { %3347 = vmatprep.subr.bf16.mxu1 %v3566_v34 }
 0x7f2   :  { %2691 = vmatmul.mubr.bf16.vlgmr.msra.gmra.mrb[40].mxu0 %v1459_v38 }
 0x7f3   :  { %2731 = vmatmul.mubr.bf16.vlgmr.msra.gmra.mrb[44].mxu1 %v1461_v21  ;;  %3326 = vmatpush3.bf16.msra.mxu0 %v3567_v37 }
 0x7f4   :  { %2770 = vmatprep.mubr.bf16.mxu0 %v1464_v41  ;;  %3348 = vmatpush3.bf16.msra.mxu1 %v3568_v39 }
 0x7f5   :  { %2810 = vmatprep.mubr.bf16.mxu1 %v1466_v44  ;;  %3327 = vmatprep.subr.bf16.mxu0 %v3569_v40 }
 0x7f6   :  { %3349 = vmatprep.subr.bf16.mxu1 %v3570_v42 }
 0x7f7   :  { %3328 = vmatpush3.bf16.msra.mxu0 %v3571_v45 }
 0x7f8   :  { %3350 = vmatpush3.bf16.msra.mxu1 %v3572_v46  ;;  %3329 = vmatprep.subr.bf16.mxu0 %v3573_v47 }
 0x7f9   :  { %3351 = vmatprep.subr.bf16.mxu1 %v3574_v48 }
 0x7fb   :  { %3330 = vmatpush3.bf16.msra.mxu0 %v3575_v49 }
 0x7fc   :  { %3352 = vmatpush3.bf16.msra.mxu1 %v3576_v50  ;;  %3331 = vmatprep.subr.bf16.mxu0 %v3577_v51 }
 0x7fd   :  { %3353 = vmatprep.subr.bf16.mxu1 %v3578_v52 }
 0x7ff   :  { %3332 = vmatpush3.bf16.msra.mxu0 %v3579_v63 }
 0x800   :  { %3354 = vmatpush3.bf16.msra.mxu1 %v3580_v0  ;;  %3333 = vmatprep.subr.bf16.mxu0 %v3581_v2 }
 0x801   :  { %3355 = vmatprep.subr.bf16.mxu1 %v3582_v1 }
 0x803   :  { %3334 = vmatpush3.bf16.msra.mxu0 %v3583_v3 }
 0x804   :  { %3356 = vmatpush3.bf16.msra.mxu1 %v3584_v5  ;;  %3335 = vmatprep.subr.bf16.mxu0 %v3585_v6 }
 0x805   :  { %3357 = vmatprep.subr.bf16.mxu1 %v3586_v9 }
 0x807   :  { %3336 = vmatpush3.bf16.msra.mxu0 %v3587_v10 }
 0x808   :  { %3358 = vmatpush3.bf16.msra.mxu1 %v3588_v11  ;;  %3337 = vmatprep.subr.bf16.mxu0 %v3589_v12 }
 0x809   :  { %3359 = vmatprep.subr.bf16.mxu1 %v3590_v13 }
 0x80b   :  { %3338 = vmatpush3.bf16.msra.mxu0 %v3591_v14 }
 0x80c   :  { %3360 = vmatpush3.bf16.msra.mxu1 %v3592_v15  ;;  %3339 = vmatprep.subr.bf16.mxu0 %v3593_v16 }
 0x80d   :  { %3361 = vmatprep.subr.bf16.mxu1 %v3594_v58 }
 0x80f   :  { %3340 = vmatpush3.bf16.msra.mxu0 %v3595_v54  ;;  %v2849_v54 = vld [vmem:[#allocation2] sm:$0x1] }
 0x810   :  { %3362 = vmatpush3.bf16.msra.mxu1 %v3596_v17  ;;  %3438 = vmatprep.subr.mxu0 %v3641_v4 }
 0x811   :  { %2852 = vperm.xlu1 %3467, %v2849_v54  }
 0x812   :  { %2771 = vmatmul.mubr.bf16.vlgmr.msra.gmra.mrb[44].mxu0 %v1463_v43 }
 0x813   :  { %2811 = vmatmul.mubr.bf16.vlgmr.msra.gmra.mrb[48].mxu1 %v1465_v59  ;;  %3440 = vmatprep.mubr.msk.f32.mxu0 %vm3642_vm1, %v3641_v4 }
 0x885   :  { %v3209_v7 = vpop.f32.mrb[32].mxu0  ;;  %v3231_v61 = vpop.f32.mrb[36].mxu1 }
 0x886   :  { %v3210_v20 = vpop.f32.mrb[33].mxu0  ;;  %v3232_v8 = vpop.f32.mrb[37].mxu1 }
 0x887   :  { %v3211_v22 = vadd.f32 %v3210_v20, %v3209_v7  ;;  %v3233_v23 = vadd.f32 %v3232_v8, %v3231_v61  ;;  %v3212_v24 = vpop.f32.mrb[34].mxu0  ;;  %v3234_v25 = vpop.f32.mrb[38].mxu1  ;;  %v3165_v7 = vld [vmem:[%s4596_s11] ss:$0 sm:$0xff] }
 0x888   :  { %v3213_v57 = vpop.f32.mrb[35].mxu0  ;;  %v3235_v26 = vpop.f32.mrb[39].mxu1  ;;  %v2848_v20 = vld [vmem:[%s4597_s12] sm:$0x1] }
 0x889   :  { %v2533_v28 = vadd.f32 %v3211_v22, %v3035_v62 }
 0x88b   :  { %v2573_v53 = vadd.f32 %v3233_v23, %v2533_v28 }
 0x890   :  { %v2853_v8 = vpop.permute.xlu1 %2852 }
 0x891   :  { %v2858_v22 = vrot.slane %v2853_v8, %v4201_v31 }
 0x8a5   :  { %v3253_v55 = vpop.f32.mrb[36].mxu0  ;;  %v3275_v29 = vpop.f32.mrb[40].mxu1 }
 0x8a6   :  { %v3254_v19 = vpop.f32.mrb[37].mxu0  ;;  %v3276_v4 = vpop.f32.mrb[41].mxu1 }
 0x8a7   :  { %v3255_v27 = vadd.f32 %v3254_v19, %v3253_v55  ;;  %v3277_v30 = vadd.f32 %v3276_v4, %v3275_v29  ;;  %v3256_v32 = vpop.f32.mrb[38].mxu0  ;;  %v3278_v33 = vpop.f32.mrb[42].mxu1 }
 0x8a8   :  { %v3257_v34 = vpop.f32.mrb[39].mxu0  ;;  %v3279_v35 = vpop.f32.mrb[43].mxu1 }
 0x8a9   :  { %v2613_v36 = vadd.f32 %v3255_v27, %v2573_v53 }
 0x8ab   :  { %v2653_v37 = vadd.f32 %v3277_v30, %v2613_v36 }
 0x8c5   :  { %v3297_v38 = vpop.f32.mrb[40].mxu0 }
 0x8c6   :  { %v3319_v39 = vpop.f32.mrb[44].mxu1  ;;  %v3298_v21 = vpop.f32.mrb[41].mxu0 }
 0x8c7   :  { %v3299_v40 = vadd.f32 %v3298_v21, %v3297_v38  ;;  %v3320_v41 = vpop.f32.mrb[45].mxu1  ;;  %v3300_v42 = vpop.f32.mrb[42].mxu0 }
 0x8c8   :  { %v3321_v44 = vadd.f32 %v3320_v41, %v3319_v39  ;;  %v3322_v45 = vpop.f32.mrb[46].mxu1  ;;  %v3301_v46 = vpop.f32.mrb[43].mxu0 }
 0x8c9   :  { %v2693_v47 = vadd.f32 %v3299_v40, %v2653_v37  ;;  %v3323_v48 = vpop.f32.mrb[47].mxu1 }
 0x8cb   :  { %v2733_v49 = vadd.f32 %v3321_v44, %v2693_v47 }
 0x8e5   :  { %v3341_v50 = vpop.f32.mrb[44].mxu0 }
 0x8e6   :  { %v3363_v51 = vpop.f32.mrb[48].mxu1  ;;  %v3342_v52 = vpop.f32.mrb[45].mxu0 }
 0x8e7   :  { %v3343_v63 = vadd.f32 %v3342_v52, %v3341_v50  ;;  %v3364_v0 = vpop.f32.mrb[49].mxu1  ;;  %v3344_v2 = vpop.f32.mrb[46].mxu0 }
 0x8e8   :  { %v3365_v1 = vadd.f32 %v3364_v0, %v3363_v51  ;;  %v3366_v3 = vpop.f32.mrb[50].mxu1  ;;  %v3345_v5 = vpop.f32.mrb[47].mxu0 }
 0x8e9   :  { %v2773_v6 = vadd.f32 %v3343_v63, %v2733_v49  ;;  %v3367_v9 = vpop.f32.mrb[51].mxu1 }
 0x8eb   :  { %v2813_v10 = vadd.f32 %v3365_v1, %v2773_v6 }
 0x8ed   :  { %v2818_v11 = vadd.f32 %v2813_v10, %v3937_v56  ;;  %v3164_v56 = vld [vmem:[%s4595_s10] ss:$0 sm:$0xff]  ;;  %s2943_s10 = sshll.u32 %s3652_s17, 4  ;;  %s2944_s10 = int_to_ptr.vmem [resolvable:$true] %s2943_s10 }
 0x8ee   :  { %s3617_s11 = scalar_lea.vmem %s2944_s10, 16  ;;  %s3621_s18 = scalar_lea.vmem %s2944_s10, 32 }
 0x8ef   :  { %v2821_v12 = vsel %vm530_vm6, %v2818_v11, 0.0  ;;  %p3618_p0 = scmp.ne.s32.totalorder %s2944_s10, %s3617_s11  ;;  %p3622_p1 = scmp.lt.s32.totalorder %s2944_s10, %s2944_s10 }
 0x8f0   :  { %2822 = vadd.xlane.f32.xlu0 %v2821_v12  ;;  %p3623_p2 = scmp.lt.s32.totalorder %s3621_s18, %s3617_s11 }
 0x8f2   :  { %p3624_p3 = por %p3623_p2, %p3622_p1 }
 0x8f4   :  { %p3625_p4 = pnand %p3624_p3, %p3618_p0 }
 0x97d   :  { %v2823_v13 = vpop.xlane.xlu0 %2822 }
 0x97e   :  { %v2824_v14 = vmul.f32 0.015625, %v2823_v13 }
 0x980   :  { %v2825_v15 = vsub.f32 %v2818_v11, %v2824_v14 }
 0x982   :  { %v2826_v16 = vmul.f32 %v2825_v15, %v2825_v15 }
 0x984   :  { %v2827_v58 = vsel %vm530_vm6, %v2826_v16, 0.0 }
 0x985   :  { %2828 = vadd.xlane.f32.xlu0 %v2827_v58 }
 0xa12   :  { %v2829_v60 = vpop.xlane.xlu0 %2828 }
 0xa13   :  { %v2830_v17 = vmul.f32 0.015625, %v2829_v60 }
 0xa15   :  { %v2831_v18 = vadd.f32 1e-05, %v2830_v17 }
 0xa17   :  { %3615 = vrsqrt.f32 %v2831_v18 }
 0xa21   :  { %v3616_v43 = vpop.eup %3615 }
 0xa22   :  { %v2833_v59 = vmul.f32 %v3616_v43, %v2825_v15 }
 0xa24   :  { %v2840_v61 = vmul.f32 %v3164_v56, %v2833_v59 }
 0xa26   :  { %v2847_v62 = vadd.f32 %v3165_v7, %v2840_v61 }
 0xa28   :  { %3439 = vmatpush3.xpose.msk.msra.mxu0 %vm530_vm6, %v2847_v62 }
 0xa2b   :  { %3441 = vmatmul.mubr.msk.f32.vlgmr.msra.gmra.mrb[48].mxu0 %vm530_vm6, %v2848_v20 }
 0xafe   :  { %v2931_v23 = vpop.f32.mrb[48].mxu0 }
 0xaff   :  { %v2932_v24 = vadd.f32 %v2931_v23, %v2858_v22  ;;  %v3442_v25 = vpop.f32.mrb[49].mxu0 }
 0xb01   :  { %2936 = vst.msk [vmem:[#allocation3] sm:$0x1] %vm2935_vm7, %v2932_v24 }
 0xb02   :  { %3628 = shalt.err (!%p3625_p4)
}
 0xb03   :  { %s3629_s1 = scalar_lea.hbm %s4599_s14, 16 }
 0xb04   :  { %p3630_p5 = scmp.ne.s32.totalorder %s4599_s14, %s3629_s1  ;;  %p3633_p6 = scmp.lt.u32.totalorder %s3629_s1, %s4599_s14 }
 0xb06   :  { %p3635_p7 = pnand %p3633_p6, %p3630_p5 }
 0xb08   :  { %3638 = shalt.err (!%p3635_p7)
}
 0xb09   :  { %2946 = dma.vmem_to_hbm [thread:$0]  %s2944_s10, 16, %s4599_s14, [#allocation4]  }
 0xb0a   :  { %3639 = dma.done.wait [#allocation4], 16  }
 0xb0b   :  { %3640 = vsyncadd [#allocation4], 4294967280 }
 0xb0c   :  { %2950 = vsyncpa [#allocation4], 1 }

</bundles_post_ra>
